<compile_context>
chip_gen: v7x
topology: tpu7x:2x2x1
jax: 0.10.0
libtpu: 0.0.40
codegen_flags: <defaults>
</compile_context>

<pallas_src>
import functools
import math

import jax
import jax.numpy as jnp
from jax.experimental import pallas as pl
from jax.experimental.pallas import tpu as pltpu

NEG_INF = -1e9


def _round_up(x, m):
    return ((x + m - 1) // m) * m


def _default_vmem_limit():
    # ~75% of physical VMEM: ~96 MiB on v5e/v6e (128 MiB), ~48 MiB on v7x (64 MiB).
    try:
        cap = pltpu.get_tpu_info().vmem_capacity_bytes
        if not cap or cap <= 0:
            cap = 64 * 1024 * 1024
    except Exception:
        cap = 64 * 1024 * 1024
    return int(cap * 3 // 4)


_VMEM_LIMIT = _default_vmem_limit()


def _cparams(*sem):
    return pltpu.CompilerParams(dimension_semantics=sem,
                                vmem_limit_bytes=_VMEM_LIMIT)


def _pick_tile(dim, want):
    """Largest of (want, 512, 256, 128) that divides dim, else the full dim."""
    for t in (want, 512, 256, 128):
        if t <= want and dim % t == 0:
            return t
    return dim


# ----------------------------- tiled linear ---------------------------------

def _matmul_kernel(x_ref, w_ref, b_ref, o_ref, acc_ref, *, activation):
    @pl.when(pl.program_id(2) == 0)
    def _():
        acc_ref[...] = jnp.zeros_like(acc_ref)

    acc_ref[...] += jnp.dot(x_ref[...], w_ref[...],
                            preferred_element_type=jnp.float32)

    @pl.when(pl.program_id(2) == pl.num_programs(2) - 1)
    def _():
        y = acc_ref[...] + b_ref[...]
        if activation == "relu":
            y = jnp.maximum(y, 0.0)
        o_ref[...] = y.astype(o_ref.dtype)


def linear(x, w, b2d, activation="none", out_dtype=jnp.bfloat16,
           *, tm=256, tn=512, tk=512):
    """x: (M, K) bf16, w: (K, N) bf16, b2d: (1, N) f32 -> (M, N) out_dtype.

    Weight dims are tiled only when the tile divides them exactly (otherwise
    the full dim is used as one block), so weights are never padded per-call.
    """
    M, K = x.shape
    _, N = w.shape
    tk = _pick_tile(K, tk)
    tn = _pick_tile(N, tn)
    tm = min(tm, _round_up(M, 8))
    Mp = _round_up(M, tm)
    xp = x if Mp == M else jnp.pad(x, ((0, Mp - M), (0, 0)))

    out = pl.pallas_call(
        functools.partial(_matmul_kernel, activation=activation),
        out_shape=jax.ShapeDtypeStruct((Mp, N), out_dtype),
        grid=(Mp // tm, N // tn, K // tk),
        in_specs=[
            pl.BlockSpec((tm, tk), lambda i, j, k: (i, k)),
            pl.BlockSpec((tk, tn), lambda i, j, k: (k, j)),
            pl.BlockSpec((1, tn), lambda i, j, k: (0, j)),
        ],
        out_specs=pl.BlockSpec((tm, tn), lambda i, j, k: (i, j)),
        scratch_shapes=[pltpu.VMEM((tm, tn), jnp.float32)],
        compiler_params=_cparams("parallel", "parallel", "arbitrary"),
    )(xp, w, b2d)
    return out if Mp == M else out[:M]


# ------------------ fused out-projection + residual + LayerNorm -------------

def _linear_res_ln_kernel(x_ref, w_ref, b_ref, r_ref, g_ref, be_ref, o_ref):
    y = jnp.dot(x_ref[...], w_ref[...], preferred_element_type=jnp.float32)
    y = y + b_ref[...] + r_ref[...].astype(jnp.float32)
    mean = jnp.mean(y, axis=-1, keepdims=True)
    c = y - mean
    var = jnp.mean(c * c, axis=-1, keepdims=True)
    o_ref[...] = (c * jax.lax.rsqrt(var + 1e-5) * g_ref[...] + be_ref[...]
                  ).astype(o_ref.dtype)


def linear_residual_ln(x, w, b2d, residual, gamma2d, beta2d, *, tm=256):
    """LayerNorm(residual + x @ w + b).  x/residual: (M, D) bf16 -> (M, D) bf16."""
    M, D = x.shape
    tm = min(tm, _round_up(M, 8))
    Mp = _round_up(M, tm)
    xp = x if Mp == M else jnp.pad(x, ((0, Mp - M), (0, 0)))
    rp = residual if Mp == M else jnp.pad(residual, ((0, Mp - M), (0, 0)))

    out = pl.pallas_call(
        _linear_res_ln_kernel,
        out_shape=jax.ShapeDtypeStruct((Mp, D), jnp.bfloat16),
        grid=(Mp // tm,),
        in_specs=[
            pl.BlockSpec((tm, D), lambda i: (i, 0)),
            pl.BlockSpec((D, D), lambda i: (0, 0)),
            pl.BlockSpec((1, D), lambda i: (0, 0)),
            pl.BlockSpec((tm, D), lambda i: (i, 0)),
            pl.BlockSpec((1, D), lambda i: (0, 0)),
            pl.BlockSpec((1, D), lambda i: (0, 0)),
        ],
        out_specs=pl.BlockSpec((tm, D), lambda i: (i, 0)),
        compiler_params=_cparams("parallel"),
    )(xp, w, b2d, rp, gamma2d, beta2d)
    return out if Mp == M else out[:M]


# ------------------------------ LayerNorm ------------------------------------

def _ln_kernel(x_ref, g_ref, b_ref, o_ref):
    x = x_ref[...].astype(jnp.float32)
    mean = jnp.mean(x, axis=-1, keepdims=True)
    c = x - mean
    var = jnp.mean(c * c, axis=-1, keepdims=True)
    o_ref[...] = (c * jax.lax.rsqrt(var + 1e-5) * g_ref[...] + b_ref[...]
                  ).astype(o_ref.dtype)


def layer_norm(x, gamma2d, beta2d, *, tm=256):
    """LayerNorm over the last dim.  x: (M, D) bf16 -> (M, D) bf16."""
    M, D = x.shape
    tm = min(tm, _round_up(M, 8))
    Mp = _round_up(M, tm)
    xp = x if Mp == M else jnp.pad(x, ((0, Mp - M), (0, 0)))
    out = pl.pallas_call(
        _ln_kernel,
        out_shape=jax.ShapeDtypeStruct((Mp, D), jnp.bfloat16),
        grid=(Mp // tm,),
        in_specs=[pl.BlockSpec((tm, D), lambda i: (i, 0)),
                  pl.BlockSpec((1, D), lambda i: (0, 0)),
                  pl.BlockSpec((1, D), lambda i: (0, 0))],
        out_specs=pl.BlockSpec((tm, D), lambda i: (i, 0)),
        compiler_params=_cparams("parallel"),
    )(xp, gamma2d, beta2d)
    return out if Mp == M else out[:M]


# --------------------- fused FFN (w1+relu+w2) + residual + LN ----------------

def _ffn_ln_kernel(x_ref, w1_ref, b1_ref, w2_ref, b2_ref, g_ref, be_ref, o_ref):
    x = x_ref[...]                                                    # (tm, D) bf16
    h = jnp.dot(x, w1_ref[...], preferred_element_type=jnp.float32) + b1_ref[...]
    h = jnp.maximum(h, 0.0)
    f = jnp.dot(h.astype(jnp.bfloat16), w2_ref[...],
                preferred_element_type=jnp.float32) + b2_ref[...]
    y = x.astype(jnp.float32) + f
    mean = jnp.mean(y, axis=-1, keepdims=True)
    c = y - mean
    var = jnp.mean(c * c, axis=-1, keepdims=True)
    o_ref[...] = (c * jax.lax.rsqrt(var + 1e-5) * g_ref[...] + be_ref[...]
                  ).astype(o_ref.dtype)


def ffn_layer_norm(x, w1, b1_2d, w2, b2_2d, gamma2d, beta2d, *, tm=256):
    """LayerNorm(x + relu(x@w1+b1)@w2+b2).  x: (M, D) bf16 -> (M, D) bf16."""
    M, D = x.shape
    F = w1.shape[1]
    tm = min(tm, _round_up(M, 8))
    Mp = _round_up(M, tm)
    xp = x if Mp == M else jnp.pad(x, ((0, Mp - M), (0, 0)))

    out = pl.pallas_call(
        _ffn_ln_kernel,
        out_shape=jax.ShapeDtypeStruct((Mp, D), jnp.bfloat16),
        grid=(Mp // tm,),
        in_specs=[
            pl.BlockSpec((tm, D), lambda i: (i, 0)),
            pl.BlockSpec((D, F), lambda i: (0, 0)),
            pl.BlockSpec((1, F), lambda i: (0, 0)),
            pl.BlockSpec((F, D), lambda i: (0, 0)),
            pl.BlockSpec((1, D), lambda i: (0, 0)),
            pl.BlockSpec((1, D), lambda i: (0, 0)),
            pl.BlockSpec((1, D), lambda i: (0, 0)),
        ],
        out_specs=pl.BlockSpec((tm, D), lambda i: (i, 0)),
        compiler_params=_cparams("parallel"),
    )(xp, w1, b1_2d, w2, b2_2d, gamma2d, beta2d)
    return out if Mp == M else out[:M]


# ----------------------- flash attention, grid = (N, H, kv) ------------------

def _flash_attn_kernel(*refs, causal, scale, block_kv, has_bias):
    if has_bias:
        q_ref, kT_ref, v_ref, bias_ref, o_ref, m_sc, l_sc, acc_sc = refs
    else:
        q_ref, kT_ref, v_ref, o_ref, m_sc, l_sc, acc_sc = refs

    kv = pl.program_id(2)

    @pl.when(kv == 0)
    def _():
        m_sc[...] = jnp.full(m_sc.shape, -jnp.inf, jnp.float32)
        l_sc[...] = jnp.zeros(l_sc.shape, jnp.float32)
        acc_sc[...] = jnp.zeros(acc_sc.shape, jnp.float32)

    q = q_ref[0, 0]                                    # (Lq, Dh) bf16
    kT = kT_ref[0, 0]                                  # (Dh, bkv) bf16
    s = jnp.dot(q, kT, preferred_element_type=jnp.float32) * scale   # (Lq, bkv)
    if has_bias:
        s = s + bias_ref[0]                            # (1, bkv) additive
    if causal:
        lq = q.shape[0]
        row = jax.lax.broadcasted_iota(jnp.int32, (lq, block_kv), 0)
        col = jax.lax.broadcasted_iota(jnp.int32, (lq, block_kv), 1) + kv * block_kv
        s = jnp.where(col > row, NEG_INF, s)

    m_prev = m_sc[...]
    m_new = jnp.maximum(m_prev, jnp.max(s, axis=-1, keepdims=True))
    alpha = jnp.exp(m_prev - m_new)
    p = jnp.exp(s - m_new)
    l_sc[...] = alpha * l_sc[...] + jnp.sum(p, axis=-1, keepdims=True)
    acc_sc[...] = alpha * acc_sc[...] + jnp.dot(
        p.astype(jnp.bfloat16), v_ref[0, 0], preferred_element_type=jnp.float32)
    m_sc[...] = m_new

    @pl.when(kv == pl.num_programs(2) - 1)
    def _():
        o_ref[0, 0] = (acc_sc[...] * pl.reciprocal(l_sc[...], approx=True)
                       ).astype(o_ref.dtype)


def flash_attention(q, kT, v, bias, *, causal):
    """q: (N,H,Lq,Dh) bf16, kT: (N,H,Dh,Lk) bf16, v: (N,H,Lk,Dh) bf16,
    bias: (N,1,Lk) additive f32 or None -> (N,H,Lq,Dh) bf16."""
    N, H, Lq, Dh = q.shape
    Lk = v.shape[2]

    block_kv = Lk if Lk <= 512 else 512
    Lkp = _round_up(Lk, block_kv)
    if Lkp != Lk:
        kT = jnp.pad(kT, ((0, 0), (0, 0), (0, 0), (0, Lkp - Lk)))
        v = jnp.pad(v, ((0, 0), (0, 0), (0, Lkp - Lk), (0, 0)))
        pad_bias = jnp.where(jnp.arange(Lkp) >= Lk, NEG_INF, 0.0).astype(jnp.float32)
        pad_bias = jnp.broadcast_to(pad_bias[None, None, :], (N, 1, Lkp))
        if bias is None:
            bias = pad_bias
        else:
            bias = jnp.pad(bias, ((0, 0), (0, 0), (0, Lkp - Lk))) + pad_bias

    has_bias = bias is not None
    scale = 1.0 / math.sqrt(Dh)

    in_specs = [
        pl.BlockSpec((1, 1, Lq, Dh), lambda b, h, k: (b, h, 0, 0)),
        pl.BlockSpec((1, 1, Dh, block_kv), lambda b, h, k: (b, h, 0, k)),
        pl.BlockSpec((1, 1, block_kv, Dh), lambda b, h, k: (b, h, k, 0)),
    ]
    args = [q, kT, v]
    if has_bias:
        in_specs.append(pl.BlockSpec((1, 1, block_kv), lambda b, h, k: (b, 0, k)))
        args.append(bias)

    return pl.pallas_call(
        functools.partial(_flash_attn_kernel, causal=causal, scale=scale,
                          block_kv=block_kv, has_bias=has_bias),
        out_shape=jax.ShapeDtypeStruct((N, H, Lq, Dh), jnp.bfloat16),
        grid=(N, H, Lkp // block_kv),
        in_specs=in_specs,
        out_specs=pl.BlockSpec((1, 1, Lq, Dh), lambda b, h, k: (b, h, 0, 0)),
        scratch_shapes=[pltpu.VMEM((Lq, 1), jnp.float32),
                        pltpu.VMEM((Lq, 1), jnp.float32),
                        pltpu.VMEM((Lq, Dh), jnp.float32)],
        compiler_params=_cparams("parallel", "parallel", "arbitrary"),
    )(*args)


# -------------------------------- model glue ---------------------------------

def mha_self(p, x2d, kpm_bias, N, L, num_heads, causal, norm_g, norm_b):
    """LayerNorm(x + SelfAttn(x)).  x2d: (N*L, D) bf16 -> (N*L, D) bf16."""
    D = x2d.shape[1]
    Dh = D // num_heads
    qkv = linear(x2d, p["wqkv"], p["bqkv"])                     # (N*L, 3D) bf16
    qkv = qkv.reshape(N, L, 3, num_heads, Dh)
    q = qkv[:, :, 0].transpose(0, 2, 1, 3)                      # (N, H, L, Dh)
    kT = qkv[:, :, 1].transpose(0, 2, 3, 1)                     # (N, H, Dh, L)
    v = qkv[:, :, 2].transpose(0, 2, 1, 3)                      # (N, H, L, Dh)
    o = flash_attention(q, kT, v, kpm_bias, causal=causal)      # (N, H, L, Dh)
    ctx = o.transpose(0, 2, 1, 3).reshape(N * L, D)             # (N*L, D) bf16
    return linear_residual_ln(ctx, p["wo"], p["bo"], x2d, norm_g, norm_b)


def mha_cross(p, y2d, mem2d, N, Lq, Lk, num_heads, norm_g, norm_b):
    """LayerNorm(y + CrossAttn(y, mem)).  y2d: (N*Lq, D), mem2d: (N*Lk, D)."""
    D = y2d.shape[1]
    Dh = D // num_heads
    q = linear(y2d, p["wq"], p["bq"]
               ).reshape(N, Lq, num_heads, Dh).transpose(0, 2, 1, 3)
    kv = linear(mem2d, p["wkv"], p["bkv"]).reshape(N, Lk, 2, num_heads, Dh)
    kT = kv[:, :, 0].transpose(0, 2, 3, 1)                      # (N, H, Dh, Lk)
    v = kv[:, :, 1].transpose(0, 2, 1, 3)                       # (N, H, Lk, Dh)
    o = flash_attention(q, kT, v, None, causal=False)
    ctx = o.transpose(0, 2, 1, 3).reshape(N * Lq, D)
    return linear_residual_ln(ctx, p["wo"], p["bo"], y2d, norm_g, norm_b)


def encoder_layer(p, x2d, kpm_bias, N, L, num_heads):
    x1 = mha_self(p["self_attn"], x2d, kpm_bias, N, L, num_heads, False,
                  p["norm1_g"], p["norm1_b"])
    return ffn_layer_norm(x1, p["w1"], p["b1"], p["w2"], p["b2"],
                          p["norm2_g"], p["norm2_b"])


def decoder_layer(p, y2d, mem2d, N, Lt, Ls, num_heads):
    y1 = mha_self(p["self_attn"], y2d, None, N, Lt, num_heads, True,
                  p["norm1_g"], p["norm1_b"])
    y2 = mha_cross(p["cross_attn"], y1, mem2d, N, Lt, Ls, num_heads,
                   p["norm2_g"], p["norm2_b"])
    return ffn_layer_norm(y2, p["w1"], p["b1"], p["w2"], p["b2"],
                          p["norm3_g"], p["norm3_b"])


def transformer_forward(params, source, target, *, num_heads, pad_idx):
    """source: (Ls, N) int32, target: (Lt, N) int32 -> (Lt, N, tgt_vocab) f32."""
    Ls, N = source.shape
    Lt, _ = target.shape
    D = params["src_emb"].shape[1]

    src = source.T                                            # (N, Ls)
    tgt = target.T                                            # (N, Lt)

    # Embeddings (gathers are XLA glue; dense math lives in Pallas kernels).
    x = jnp.take(params["src_emb"], src, axis=0) + params["src_pos_emb"][None, :Ls, :]
    y = jnp.take(params["tgt_emb"], tgt, axis=0) + params["tgt_pos_emb"][None, :Lt, :]
    x2d = x.reshape(N * Ls, D).astype(jnp.bfloat16)
    y2d = y.reshape(N * Lt, D).astype(jnp.bfloat16)
    # TODO(synk): dropout -> identity (inference semantics).

    # Tiny additive key-padding bias (N, 1, Ls); causal mask is built in-kernel,
    # cross-attention has no mask (memory_key_padding_mask=None).
    kpm_bias = jnp.where(src == pad_idx, NEG_INF, 0.0
                         ).astype(jnp.float32).reshape(N, 1, Ls)

    for p in params["encoder_layers"]:
        x2d = encoder_layer(p, x2d, kpm_bias, N, Ls, num_heads)
    mem2d = layer_norm(x2d, params["enc_norm_g"], params["enc_norm_b"])

    for p in params["decoder_layers"]:
        y2d = decoder_layer(p, y2d, mem2d, N, Lt, Ls, num_heads)
    dec2d = layer_norm(y2d, params["dec_norm_g"], params["dec_norm_b"])

    # Produce logits directly in (Lt, N, V): transpose the small D-wide decoder
    # activation rather than the (much larger) logits tensor.
    dec_lnb = dec2d.reshape(N, Lt, D).transpose(1, 0, 2).reshape(Lt * N, D)
    logits = linear(dec_lnb, params["fc_w"], params["fc_b"],
                    out_dtype=jnp.float32, tn=1024)
    V = params["fc_w"].shape[1]
    return logits.reshape(Lt, N, V)


# ------------------------------ parameter init --------------------------------

def _bf16_normal(key, shape, scale):
    return (jax.random.normal(key, shape, jnp.float32) * scale).astype(jnp.bfloat16)


def _zeros_row(n):
    return jnp.zeros((1, n), jnp.float32)


def _ones_row(n):
    return jnp.ones((1, n), jnp.float32)


def _init_mha_self(key, d):
    k1, k2 = jax.random.split(key)
    s = 1.0 / math.sqrt(d)
    return {"wqkv": _bf16_normal(k1, (d, 3 * d), s), "bqkv": _zeros_row(3 * d),
            "wo": _bf16_normal(k2, (d, d), s), "bo": _zeros_row(d)}


def _init_mha_cross(key, d):
    k1, k2, k3 = jax.random.split(key, 3)
    s = 1.0 / math.sqrt(d)
    return {"wq": _bf16_normal(k1, (d, d), s), "bq": _zeros_row(d),
            "wkv": _bf16_normal(k2, (d, 2 * d), s), "bkv": _zeros_row(2 * d),
            "wo": _bf16_normal(k3, (d, d), s), "bo": _zeros_row(d)}


def _init_ffn(key, d, f):
    k1, k2 = jax.random.split(key)
    return {"w1": _bf16_normal(k1, (d, f), 1.0 / math.sqrt(d)), "b1": _zeros_row(f),
            "w2": _bf16_normal(k2, (f, d), 1.0 / math.sqrt(f)), "b2": _zeros_row(d)}


def init_params(key, *, d_model, ffn, n_enc, n_dec, src_vocab, tgt_vocab, max_len):
    keys = iter(jax.random.split(key, 64))
    params = {
        "src_emb": jax.random.normal(next(keys), (src_vocab, d_model), jnp.float32) * 0.1,
        "tgt_emb": jax.random.normal(next(keys), (tgt_vocab, d_model), jnp.float32) * 0.1,
        "src_pos_emb": jax.random.normal(next(keys), (max_len, d_model), jnp.float32) * 0.1,
        "tgt_pos_emb": jax.random.normal(next(keys), (max_len, d_model), jnp.float32) * 0.1,
        "enc_norm_g": _ones_row(d_model), "enc_norm_b": _zeros_row(d_model),
        "dec_norm_g": _ones_row(d_model), "dec_norm_b": _zeros_row(d_model),
        "fc_w": _bf16_normal(next(keys), (d_model, tgt_vocab), 1.0 / math.sqrt(d_model)),
        "fc_b": _zeros_row(tgt_vocab),
        "encoder_layers": [],
        "decoder_layers": [],
    }
    for _ in range(n_enc):
        layer = {"self_attn": _init_mha_self(next(keys), d_model)}
        layer.update(_init_ffn(next(keys), d_model, ffn))
        layer.update({"norm1_g": _ones_row(d_model), "norm1_b": _zeros_row(d_model),
                      "norm2_g": _ones_row(d_model), "norm2_b": _zeros_row(d_model)})
        params["encoder_layers"].append(layer)
    for _ in range(n_dec):
        layer = {"self_attn": _init_mha_self(next(keys), d_model),
                 "cross_attn": _init_mha_cross(next(keys), d_model)}
        layer.update(_init_ffn(next(keys), d_model, ffn))
        layer.update({"norm1_g": _ones_row(d_model), "norm1_b": _zeros_row(d_model),
                      "norm2_g": _ones_row(d_model), "norm2_b": _zeros_row(d_model),
                      "norm3_g": _ones_row(d_model), "norm3_b": _zeros_row(d_model)})
        params["decoder_layers"].append(layer)
    return params


# ----------------------------------- main -------------------------------------

if __name__ == "__main__":
    # Scaled-down smoke-test hyperparameters (original: d=512, H=8, 3+3 layers).
    # NOTE: this size is a correctness smoke test only; tune at real shapes.
    D_MODEL = 32
    NUM_HEADS = 4
    N_ENC = 2
    N_DEC = 2
    FFN = 64
    SRC_VOCAB = 50
    TGT_VOCAB = 60
    MAX_LEN = 64
    PAD_IDX = 1
    SRC_LEN, TGT_LEN, BATCH = 8, 8, 2

    key = jax.random.PRNGKey(0)
    k_param, k_src, k_tgt = jax.random.split(key, 3)

    params = init_params(k_param, d_model=D_MODEL, ffn=FFN, n_enc=N_ENC,
                         n_dec=N_DEC, src_vocab=SRC_VOCAB, tgt_vocab=TGT_VOCAB,
                         max_len=MAX_LEN)

    source = jax.random.randint(k_src, (SRC_LEN, BATCH), 2, SRC_VOCAB, jnp.int32)
    target = jax.random.randint(k_tgt, (TGT_LEN, BATCH), 2, TGT_VOCAB, jnp.int32)
    # Put a pad token in the source to exercise the key-padding mask.
    source = source.at[-1, 0].set(PAD_IDX)

    fwd = jax.jit(functools.partial(transformer_forward,
                                    num_heads=NUM_HEADS, pad_idx=PAD_IDX))
    out = fwd(params, source, target)
    out = jax.block_until_ready(out)

    assert out.shape == (TGT_LEN, BATCH, TGT_VOCAB)
    assert bool(jnp.all(jnp.isfinite(out)))
    print("KERNEL_OK")
</pallas_src>

<mosaic_0001>
module attributes {stable_mosaic.version = 11 : i64} {
  func.func @_matmul_kernel(%arg0: i32, %arg1: i32, %arg2: i32, %arg3: memref<16x32xbf16, #tpu.memory_space<vmem>>, %arg4: memref<32x96xbf16, #tpu.memory_space<vmem>>, %arg5: memref<1x96xf32, #tpu.memory_space<vmem>>, %arg6: memref<16x96xbf16, #tpu.memory_space<vmem>>, %arg7: memref<16x96xf32, #tpu.memory_space<vmem>>) attributes {dimension_semantics = [#tpu.dimension_semantics<parallel>, #tpu.dimension_semantics<parallel>, #tpu.dimension_semantics<arbitrary>], iteration_bounds = array<i64: 1, 1, 1>, scalar_prefetch = 0 : i64, scratch_operands = 1 : i64, tpu.core_type = #tpu.core_type<tc>, window_params = [{transform_indices = @transform_0, window_bounds = array<i64: 16, 32>}, {transform_indices = @transform_1, window_bounds = array<i64: 32, 96>}, {transform_indices = @transform_2, window_bounds = array<i64: 1, 96>}, {transform_indices = @transform_3, window_bounds = array<i64: 16, 96>}]} {
    %c0_i32 = arith.constant 0 : i32
    %0 = arith.cmpi eq, %arg2, %c0_i32 : i32
    %1 = arith.extui %0 : i1 to i32
    %c0_i32_0 = arith.constant 0 : i32
    %2 = arith.cmpi ne, %1, %c0_i32_0 : i32
    scf.if %2 {
      %cst_10 = arith.constant 0.000000e+00 : f32
      %12 = vector.broadcast %cst_10 : f32 to vector<16x96xf32>
      %c0_11 = arith.constant 0 : index
      %c0_12 = arith.constant 0 : index
      %13 = vector.load %arg7[%c0_11, %c0_12] : memref<16x96xf32, #tpu.memory_space<vmem>>, vector<16x96xf32>
      tpu.vector_store %arg7[%c0_11, %c0_12], %12 {strides = array<i32>} : memref<16x96xf32, #tpu.memory_space<vmem>>, vector<16x96xf32>,
    } else {
    }
    %c0 = arith.constant 0 : index
    %c0_1 = arith.constant 0 : index
    %3 = vector.load %arg7[%c0, %c0_1] : memref<16x96xf32, #tpu.memory_space<vmem>>, vector<16x96xf32>
    %c0_2 = arith.constant 0 : index
    %c0_3 = arith.constant 0 : index
    %4 = vector.load %arg3[%c0_2, %c0_3] : memref<16x32xbf16, #tpu.memory_space<vmem>>, vector<16x32xbf16>
    %c0_4 = arith.constant 0 : index
    %c0_5 = arith.constant 0 : index
    %5 = vector.load %arg4[%c0_4, %c0_5] : memref<32x96xbf16, #tpu.memory_space<vmem>>, vector<32x96xbf16>
    %cst = arith.constant dense<0.000000e+00> : vector<16x96xf32>
    %6 = tpu.matmul %4, %5, %cst {dimension_numbers = #tpu.dot_dimension_numbers<[1], [0], [0], [1], [0, 0, 1, 1], [], []>} : vector<16x32xbf16>, vector<32x96xbf16>, vector<16x96xf32> -> vector<16x96xf32>
    %7 = arith.addf %3, %6 : vector<16x96xf32>
    %c0_6 = arith.constant 0 : index
    %c0_7 = arith.constant 0 : index
    %8 = vector.load %arg7[%c0_6, %c0_7] : memref<16x96xf32, #tpu.memory_space<vmem>>, vector<16x96xf32>
    tpu.vector_store %arg7[%c0_6, %c0_7], %7 {strides = array<i32>} : memref<16x96xf32, #tpu.memory_space<vmem>>, vector<16x96xf32>,
    %c0_i32_8 = arith.constant 0 : i32
    %9 = arith.cmpi eq, %arg2, %c0_i32_8 : i32
    %10 = arith.extui %9 : i1 to i32
    %c0_i32_9 = arith.constant 0 : i32
    %11 = arith.cmpi ne, %10, %c0_i32_9 : i32
    scf.if %11 {
      %c0_10 = arith.constant 0 : index
      %c0_11 = arith.constant 0 : index
      %12 = vector.load %arg7[%c0_10, %c0_11] : memref<16x96xf32, #tpu.memory_space<vmem>>, vector<16x96xf32>
      %c0_12 = arith.constant 0 : index
      %c0_13 = arith.constant 0 : index
      %13 = vector.load %arg5[%c0_12, %c0_13] : memref<1x96xf32, #tpu.memory_space<vmem>>, vector<1x96xf32>
      %14 = vector.broadcast %13 : vector<1x96xf32> to vector<16x96xf32>
      %15 = arith.addf %12, %14 : vector<16x96xf32>
      %16 = arith.truncf %15 : vector<16x96xf32> to vector<16x96xbf16>
      %c0_14 = arith.constant 0 : index
      %c0_15 = arith.constant 0 : index
      %17 = vector.load %arg6[%c0_14, %c0_15] : memref<16x96xbf16, #tpu.memory_space<vmem>>, vector<16x96xbf16>
      tpu.vector_store %arg6[%c0_14, %c0_15], %16 {strides = array<i32>} : memref<16x96xbf16, #tpu.memory_space<vmem>>, vector<16x96xbf16>,
    } else {
    }
    return
  }
  func.func @transform_0(%arg0: i32, %arg1: i32, %arg2: i32) -> (i32, i32) {
    %c0_i32 = arith.constant 0 : i32
    return %arg0, %arg2 : i32, i32
  }
  func.func @transform_1(%arg0: i32, %arg1: i32, %arg2: i32) -> (i32, i32) {
    %c0_i32 = arith.constant 0 : i32
    return %arg2, %arg1 : i32, i32
  }
  func.func @transform_2(%arg0: i32, %arg1: i32, %arg2: i32) -> (i32, i32) {
    %c0_i32 = arith.constant 0 : i32
    %c0_i32_0 = arith.constant 0 : i32
    return %c0_i32, %arg1 : i32, i32
  }
  func.func @transform_3(%arg0: i32, %arg1: i32, %arg2: i32) -> (i32, i32) {
    %c0_i32 = arith.constant 0 : i32
    return %arg0, %arg1 : i32, i32
  }
}

module attributes {stable_mosaic.version = 11 : i64} {
  func.func @_flash_attn_kernel(%arg0: i32, %arg1: i32, %arg2: i32, %arg3: memref<1x1x8x8xbf16, #tpu.memory_space<vmem>>, %arg4: memref<1x1x8x8xbf16, #tpu.memory_space<vmem>>, %arg5: memref<1x1x8x8xbf16, #tpu.memory_space<vmem>>, %arg6: memref<1x1x8x8xbf16, #tpu.memory_space<vmem>>, %arg7: memref<8x1xf32, #tpu.memory_space<vmem>>, %arg8: memref<8x1xf32, #tpu.memory_space<vmem>>, %arg9: memref<8x8xf32, #tpu.memory_space<vmem>>) attributes {dimension_semantics = [#tpu.dimension_semantics<parallel>, #tpu.dimension_semantics<parallel>, #tpu.dimension_semantics<arbitrary>], iteration_bounds = array<i64: 2, 4, 1>, scalar_prefetch = 0 : i64, scratch_operands = 3 : i64, tpu.core_type = #tpu.core_type<tc>, window_params = [{transform_indices = @transform_0, window_bounds = array<i64: 1, 1, 8, 8>}, {transform_indices = @transform_1, window_bounds = array<i64: 1, 1, 8, 8>}, {transform_indices = @transform_2, window_bounds = array<i64: 1, 1, 8, 8>}, {transform_indices = @transform_3, window_bounds = array<i64: 1, 1, 8, 8>}]} {
    %c0_i32 = arith.constant 0 : i32
    %0 = arith.cmpi eq, %arg2, %c0_i32 : i32
    %1 = arith.extui %0 : i1 to i32
    %c0_i32_0 = arith.constant 0 : i32
    %2 = arith.cmpi ne, %1, %c0_i32_0 : i32
    scf.if %2 {
      %cst_31 = arith.constant 0xFF800000 : f32
      %46 = vector.broadcast %cst_31 : f32 to vector<8x1xf32>
      %c0_32 = arith.constant 0 : index
      %c0_33 = arith.constant 0 : index
      %47 = vector.load %arg7[%c0_32, %c0_33] : memref<8x1xf32, #tpu.memory_space<vmem>>, vector<8x1xf32>
      tpu.vector_store %arg7[%c0_32, %c0_33], %46 {strides = array<i32>} : memref<8x1xf32, #tpu.memory_space<vmem>>, vector<8x1xf32>,
      %cst_34 = arith.constant 0.000000e+00 : f32
      %48 = vector.broadcast %cst_34 : f32 to vector<8x1xf32>
      %c0_35 = arith.constant 0 : index
      %c0_36 = arith.constant 0 : index
      %49 = vector.load %arg8[%c0_35, %c0_36] : memref<8x1xf32, #tpu.memory_space<vmem>>, vector<8x1xf32>
      tpu.vector_store %arg8[%c0_35, %c0_36], %48 {strides = array<i32>} : memref<8x1xf32, #tpu.memory_space<vmem>>, vector<8x1xf32>,
      %cst_37 = arith.constant 0.000000e+00 : f32
      %50 = vector.broadcast %cst_37 : f32 to vector<8x8xf32>
      %c0_38 = arith.constant 0 : index
      %c0_39 = arith.constant 0 : index
      %51 = vector.load %arg9[%c0_38, %c0_39] : memref<8x8xf32, #tpu.memory_space<vmem>>, vector<8x8xf32>
      tpu.vector_store %arg9[%c0_38, %c0_39], %50 {strides = array<i32>} : memref<8x8xf32, #tpu.memory_space<vmem>>, vector<8x8xf32>,
    } else {
    }
    %c0 = arith.constant 0 : index
    %c0_1 = arith.constant 0 : index
    %c0_2 = arith.constant 0 : index
    %c0_3 = arith.constant 0 : index
    %3 = vector.load %arg3[%c0, %c0_1, %c0_2, %c0_3] : memref<1x1x8x8xbf16, #tpu.memory_space<vmem>>, vector<1x1x8x8xbf16>
    %4 = vector.shape_cast %3 : vector<1x1x8x8xbf16> to vector<8x8xbf16>
    %c0_4 = arith.constant 0 : index
    %c0_5 = arith.constant 0 : index
    %c0_6 = arith.constant 0 : index
    %c0_7 = arith.constant 0 : index
    %5 = vector.load %arg4[%c0_4, %c0_5, %c0_6, %c0_7] : memref<1x1x8x8xbf16, #tpu.memory_space<vmem>>, vector<1x1x8x8xbf16>
    %6 = vector.shape_cast %5 : vector<1x1x8x8xbf16> to vector<8x8xbf16>
    %cst = arith.constant dense<0.000000e+00> : vector<8x8xf32>
    %7 = tpu.matmul %4, %6, %cst {dimension_numbers = #tpu.dot_dimension_numbers<[1], [0], [0], [1], [0, 0, 1, 1], [], []>} : vector<8x8xbf16>, vector<8x8xbf16>, vector<8x8xf32> -> vector<8x8xf32>
    %cst_8 = arith.constant 0.353553385 : f32
    %8 = vector.broadcast %cst_8 : f32 to vector<8x8xf32>
    %9 = arith.mulf %7, %8 : vector<8x8xf32>
    %10 = tpu.iota {dimensions = array<i32: 0>} : vector<8x8xi32>
    %11 = tpu.iota {dimensions = array<i32: 1>} : vector<8x8xi32>
    %c8_i32 = arith.constant 8 : i32
    %12 = arith.muli %arg2, %c8_i32 : i32
    %13 = vector.broadcast %12 : i32 to vector<8x8xi32>
    %14 = arith.addi %11, %13 : vector<8x8xi32>
    %15 = arith.cmpi sgt, %14, %10 : vector<8x8xi32>
    %cst_9 = arith.constant -1.000000e+09 : f32
    %16 = vector.broadcast %cst_9 : f32 to vector<8x8xf32>
    %17 = arith.select %15, %16, %9 : vector<8x8xi1>, vector<8x8xf32>
    %c0_10 = arith.constant 0 : index
    %c0_11 = arith.constant 0 : index
    %18 = vector.load %arg7[%c0_10, %c0_11] : memref<8x1xf32, #tpu.memory_space<vmem>>, vector<8x1xf32>
    %cst_12 = arith.constant dense<0xFF800000> : vector<8xf32>
    %19 = vector.multi_reduction <maximumf>, %17, %cst_12 [1] : vector<8x8xf32> to vector<8xf32>
    %20 = vector.shape_cast %19 : vector<8xf32> to vector<8x1xf32>
    %21 = arith.maximumf %18, %20 : vector<8x1xf32>
    %22 = arith.subf %18, %21 : vector<8x1xf32>
    %23 = math.exp %22 : vector<8x1xf32>
    %24 = vector.broadcast %21 : vector<8x1xf32> to vector<8x8xf32>
    %25 = arith.subf %17, %24 : vector<8x8xf32>
    %26 = math.exp %25 : vector<8x8xf32>
    %c0_13 = arith.constant 0 : index
    %c0_14 = arith.constant 0 : index
    %27 = vector.load %arg8[%c0_13, %c0_14] : memref<8x1xf32, #tpu.memory_space<vmem>>, vector<8x1xf32>
    %28 = arith.mulf %23, %27 : vector<8x1xf32>
    %cst_15 = arith.constant dense<0.000000e+00> : vector<8xf32>
    %29 = vector.multi_reduction <add>, %26, %cst_15 [1] : vector<8x8xf32> to vector<8xf32>
    %30 = vector.shape_cast %29 : vector<8xf32> to vector<8x1xf32>
    %31 = arith.addf %28, %30 : vector<8x1xf32>
    %c0_16 = arith.constant 0 : index
    %c0_17 = arith.constant 0 : index
    %32 = vector.load %arg8[%c0_16, %c0_17] : memref<8x1xf32, #tpu.memory_space<vmem>>, vector<8x1xf32>
    tpu.vector_store %arg8[%c0_16, %c0_17], %31 {strides = array<i32>} : memref<8x1xf32, #tpu.memory_space<vmem>>, vector<8x1xf32>,
    %c0_18 = arith.constant 0 : index
    %c0_19 = arith.constant 0 : index
    %33 = vector.load %arg9[%c0_18, %c0_19] : memref<8x8xf32, #tpu.memory_space<vmem>>, vector<8x8xf32>
    %34 = vector.broadcast %23 : vector<8x1xf32> to vector<8x8xf32>
    %35 = arith.mulf %34, %33 : vector<8x8xf32>
    %36 = arith.truncf %26 : vector<8x8xf32> to vector<8x8xbf16>
    %c0_20 = arith.constant 0 : index
    %c0_21 = arith.constant 0 : index
    %c0_22 = arith.constant 0 : index
    %c0_23 = arith.constant 0 : index
    %37 = vector.load %arg5[%c0_20, %c0_21, %c0_22, %c0_23] : memref<1x1x8x8xbf16, #tpu.memory_space<vmem>>, vector<1x1x8x8xbf16>
    %38 = vector.shape_cast %37 : vector<1x1x8x8xbf16> to vector<8x8xbf16>
    %cst_24 = arith.constant dense<0.000000e+00> : vector<8x8xf32>
    %39 = tpu.matmul %36, %38, %cst_24 {dimension_numbers = #tpu.dot_dimension_numbers<[1], [0], [0], [1], [0, 0, 1, 1], [], []>} : vector<8x8xbf16>, vector<8x8xbf16>, vector<8x8xf32> -> vector<8x8xf32>
    %40 = arith.addf %35, %39 : vector<8x8xf32>
    %c0_25 = arith.constant 0 : index
    %c0_26 = arith.constant 0 : index
    %41 = vector.load %arg9[%c0_25, %c0_26] : memref<8x8xf32, #tpu.memory_space<vmem>>, vector<8x8xf32>
    tpu.vector_store %arg9[%c0_25, %c0_26], %40 {strides = array<i32>} : memref<8x8xf32, #tpu.memory_space<vmem>>, vector<8x8xf32>,
    %c0_27 = arith.constant 0 : index
    %c0_28 = arith.constant 0 : index
    %42 = vector.load %arg7[%c0_27, %c0_28] : memref<8x1xf32, #tpu.memory_space<vmem>>, vector<8x1xf32>
    tpu.vector_store %arg7[%c0_27, %c0_28], %21 {strides = array<i32>} : memref<8x1xf32, #tpu.memory_space<vmem>>, vector<8x1xf32>,
    %c0_i32_29 = arith.constant 0 : i32
    %43 = arith.cmpi eq, %arg2, %c0_i32_29 : i32
    %44 = arith.extui %43 : i1 to i32
    %c0_i32_30 = arith.constant 0 : i32
    %45 = arith.cmpi ne, %44, %c0_i32_30 : i32
    scf.if %45 {
      %c0_31 = arith.constant 0 : index
      %c0_32 = arith.constant 0 : index
      %46 = vector.load %arg9[%c0_31, %c0_32] : memref<8x8xf32, #tpu.memory_space<vmem>>, vector<8x8xf32>
      %c0_33 = arith.constant 0 : index
      %c0_34 = arith.constant 0 : index
      %47 = vector.load %arg8[%c0_33, %c0_34] : memref<8x1xf32, #tpu.memory_space<vmem>>, vector<8x1xf32>
      %48 = tpu.reciprocal %47 {approx = true} : vector<8x1xf32> -> vector<8x1xf32>
      %49 = vector.broadcast %48 : vector<8x1xf32> to vector<8x8xf32>
      %50 = arith.mulf %46, %49 : vector<8x8xf32>
      %51 = arith.truncf %50 : vector<8x8xf32> to vector<8x8xbf16>
      %c0_35 = arith.constant 0 : index
      %c0_36 = arith.constant 0 : index
      %c0_37 = arith.constant 0 : index
      %c0_38 = arith.constant 0 : index
      %52 = vector.load %arg6[%c0_35, %c0_36, %c0_37, %c0_38] : memref<1x1x8x8xbf16, #tpu.memory_space<vmem>>, vector<1x1x8x8xbf16>
      %53 = vector.shape_cast %52 : vector<1x1x8x8xbf16> to vector<8x8xbf16>
      %54 = vector.shape_cast %51 : vector<8x8xbf16> to vector<1x1x8x8xbf16>
      tpu.vector_store %arg6[%c0_35, %c0_36, %c0_37, %c0_38], %54 {strides = array<i32>} : memref<1x1x8x8xbf16, #tpu.memory_space<vmem>>, vector<1x1x8x8xbf16>,
    } else {
    }
    return
  }
  func.func @transform_0(%arg0: i32, %arg1: i32, %arg2: i32) -> (i32, i32, i32, i32) {
    %c0_i32 = arith.constant 0 : i32
    %c0_i32_0 = arith.constant 0 : i32
    %c0_i32_1 = arith.constant 0 : i32
    return %arg0, %arg1, %c0_i32, %c0_i32_0 : i32, i32, i32, i32
  }
  func.func @transform_1(%arg0: i32, %arg1: i32, %arg2: i32) -> (i32, i32, i32, i32) {
    %c0_i32 = arith.constant 0 : i32
    %c0_i32_0 = arith.constant 0 : i32
    return %arg0, %arg1, %c0_i32, %arg2 : i32, i32, i32, i32
  }
  func.func @transform_2(%arg0: i32, %arg1: i32, %arg2: i32) -> (i32, i32, i32, i32) {
    %c0_i32 = arith.constant 0 : i32
    %c0_i32_0 = arith.constant 0 : i32
    return %arg0, %arg1, %arg2, %c0_i32 : i32, i32, i32, i32
  }
  func.func @transform_3(%arg0: i32, %arg1: i32, %arg2: i32) -> (i32, i32, i32, i32) {
    %c0_i32 = arith.constant 0 : i32
    %c0_i32_0 = arith.constant 0 : i32
    %c0_i32_1 = arith.constant 0 : i32
    return %arg0, %arg1, %c0_i32, %c0_i32_0 : i32, i32, i32, i32
  }
}

module attributes {stable_mosaic.version = 11 : i64} {
  func.func @_linear_res_ln_kernel(%arg0: i32, %arg1: memref<16x32xbf16, #tpu.memory_space<vmem>>, %arg2: memref<32x32xbf16, #tpu.memory_space<vmem>>, %arg3: memref<1x32xf32, #tpu.memory_space<vmem>>, %arg4: memref<16x32xbf16, #tpu.memory_space<vmem>>, %arg5: memref<1x32xf32, #tpu.memory_space<vmem>>, %arg6: memref<1x32xf32, #tpu.memory_space<vmem>>, %arg7: memref<16x32xbf16, #tpu.memory_space<vmem>>) attributes {dimension_semantics = [#tpu.dimension_semantics<parallel>], iteration_bounds = array<i64: 1>, scalar_prefetch = 0 : i64, scratch_operands = 0 : i64, tpu.core_type = #tpu.core_type<tc>, window_params = [{transform_indices = @transform_0, window_bounds = array<i64: 16, 32>}, {pipeline_mode = #tpu.pipeline_mode<synchronous>, transform_indices = @transform_1, window_bounds = array<i64: 32, 32>}, {pipeline_mode = #tpu.pipeline_mode<synchronous>, transform_indices = @transform_2, window_bounds = array<i64: 1, 32>}, {transform_indices = @transform_3, window_bounds = array<i64: 16, 32>}, {pipeline_mode = #tpu.pipeline_mode<synchronous>, transform_indices = @transform_4, window_bounds = array<i64: 1, 32>}, {pipeline_mode = #tpu.pipeline_mode<synchronous>, transform_indices = @transform_5, window_bounds = array<i64: 1, 32>}, {transform_indices = @transform_6, window_bounds = array<i64: 16, 32>}]} {
    %c0 = arith.constant 0 : index
    %c0_0 = arith.constant 0 : index
    %0 = vector.load %arg1[%c0, %c0_0] : memref<16x32xbf16, #tpu.memory_space<vmem>>, vector<16x32xbf16>
    %c0_1 = arith.constant 0 : index
    %c0_2 = arith.constant 0 : index
    %1 = vector.load %arg2[%c0_1, %c0_2] : memref<32x32xbf16, #tpu.memory_space<vmem>>, vector<32x32xbf16>
    %cst = arith.constant dense<0.000000e+00> : vector<16x32xf32>
    %2 = tpu.matmul %0, %1, %cst {dimension_numbers = #tpu.dot_dimension_numbers<[1], [0], [0], [1], [0, 0, 1, 1], [], []>} : vector<16x32xbf16>, vector<32x32xbf16>, vector<16x32xf32> -> vector<16x32xf32>
    %c0_3 = arith.constant 0 : index
    %c0_4 = arith.constant 0 : index
    %3 = vector.load %arg3[%c0_3, %c0_4] : memref<1x32xf32, #tpu.memory_space<vmem>>, vector<1x32xf32>
    %4 = vector.broadcast %3 : vector<1x32xf32> to vector<16x32xf32>
    %5 = arith.addf %2, %4 : vector<16x32xf32>
    %c0_5 = arith.constant 0 : index
    %c0_6 = arith.constant 0 : index
    %6 = vector.load %arg4[%c0_5, %c0_6] : memref<16x32xbf16, #tpu.memory_space<vmem>>, vector<16x32xbf16>
    %7 = arith.extf %6 : vector<16x32xbf16> to vector<16x32xf32>
    %8 = arith.addf %5, %7 : vector<16x32xf32>
    %cst_7 = arith.constant dense<0.000000e+00> : vector<16xf32>
    %9 = vector.multi_reduction <add>, %8, %cst_7 [1] : vector<16x32xf32> to vector<16xf32>
    %10 = vector.shape_cast %9 : vector<16xf32> to vector<16x1xf32>
    %cst_8 = arith.constant 3.200000e+01 : f32
    %11 = vector.broadcast %cst_8 : f32 to vector<16x1xf32>
    %12 = arith.divf %10, %11 : vector<16x1xf32>
    %13 = vector.broadcast %12 : vector<16x1xf32> to vector<16x32xf32>
    %14 = arith.subf %8, %13 : vector<16x32xf32>
    %15 = arith.mulf %14, %14 : vector<16x32xf32>
    %cst_9 = arith.constant dense<0.000000e+00> : vector<16xf32>
    %16 = vector.multi_reduction <add>, %15, %cst_9 [1] : vector<16x32xf32> to vector<16xf32>
    %17 = vector.shape_cast %16 : vector<16xf32> to vector<16x1xf32>
    %cst_10 = arith.constant 3.200000e+01 : f32
    %18 = vector.broadcast %cst_10 : f32 to vector<16x1xf32>
    %19 = arith.divf %17, %18 : vector<16x1xf32>
    %cst_11 = arith.constant 9.99999974E-6 : f32
    %20 = vector.broadcast %cst_11 : f32 to vector<16x1xf32>
    %21 = arith.addf %19, %20 : vector<16x1xf32>
    %22 = math.rsqrt %21 : vector<16x1xf32>
    %23 = vector.broadcast %22 : vector<16x1xf32> to vector<16x32xf32>
    %24 = arith.mulf %14, %23 : vector<16x32xf32>
    %c0_12 = arith.constant 0 : index
    %c0_13 = arith.constant 0 : index
    %25 = vector.load %arg5[%c0_12, %c0_13] : memref<1x32xf32, #tpu.memory_space<vmem>>, vector<1x32xf32>
    %26 = vector.broadcast %25 : vector<1x32xf32> to vector<16x32xf32>
    %27 = arith.mulf %24, %26 : vector<16x32xf32>
    %c0_14 = arith.constant 0 : index
    %c0_15 = arith.constant 0 : index
    %28 = vector.load %arg6[%c0_14, %c0_15] : memref<1x32xf32, #tpu.memory_space<vmem>>, vector<1x32xf32>
    %29 = vector.broadcast %28 : vector<1x32xf32> to vector<16x32xf32>
    %30 = arith.addf %27, %29 : vector<16x32xf32>
    %31 = arith.truncf %30 : vector<16x32xf32> to vector<16x32xbf16>
    %c0_16 = arith.constant 0 : index
    %c0_17 = arith.constant 0 : index
    %32 = vector.load %arg7[%c0_16, %c0_17] : memref<16x32xbf16, #tpu.memory_space<vmem>>, vector<16x32xbf16>
    tpu.vector_store %arg7[%c0_16, %c0_17], %31 {strides = array<i32>} : memref<16x32xbf16, #tpu.memory_space<vmem>>, vector<16x32xbf16>,
    return
  }
  func.func @transform_0(%arg0: i32) -> (i32, i32) {
    %c0_i32 = arith.constant 0 : i32
    %c0_i32_0 = arith.constant 0 : i32
    return %arg0, %c0_i32 : i32, i32
  }
  func.func @transform_1(%arg0: i32) -> (i32, i32) {
    %c0_i32 = arith.constant 0 : i32
    %c0_i32_0 = arith.constant 0 : i32
    %c0_i32_1 = arith.constant 0 : i32
    return %c0_i32, %c0_i32_0 : i32, i32
  }
  func.func @transform_2(%arg0: i32) -> (i32, i32) {
    %c0_i32 = arith.constant 0 : i32
    %c0_i32_0 = arith.constant 0 : i32
    %c0_i32_1 = arith.constant 0 : i32
    return %c0_i32, %c0_i32_0 : i32, i32
  }
  func.func @transform_3(%arg0: i32) -> (i32, i32) {
    %c0_i32 = arith.constant 0 : i32
    %c0_i32_0 = arith.constant 0 : i32
    return %arg0, %c0_i32 : i32, i32
  }
  func.func @transform_4(%arg0: i32) -> (i32, i32) {
    %c0_i32 = arith.constant 0 : i32
    %c0_i32_0 = arith.constant 0 : i32
    %c0_i32_1 = arith.constant 0 : i32
    return %c0_i32, %c0_i32_0 : i32, i32
  }
  func.func @transform_5(%arg0: i32) -> (i32, i32) {
    %c0_i32 = arith.constant 0 : i32
    %c0_i32_0 = arith.constant 0 : i32
    %c0_i32_1 = arith.constant 0 : i32
    return %c0_i32, %c0_i32_0 : i32, i32
  }
  func.func @transform_6(%arg0: i32) -> (i32, i32) {
    %c0_i32 = arith.constant 0 : i32
    %c0_i32_0 = arith.constant 0 : i32
    return %arg0, %c0_i32 : i32, i32
  }
}

module attributes {stable_mosaic.version = 11 : i64} {
  func.func @_matmul_kernel(%arg0: i32, %arg1: i32, %arg2: i32, %arg3: memref<16x32xbf16, #tpu.memory_space<vmem>>, %arg4: memref<32x32xbf16, #tpu.memory_space<vmem>>, %arg5: memref<1x32xf32, #tpu.memory_space<vmem>>, %arg6: memref<16x32xbf16, #tpu.memory_space<vmem>>, %arg7: memref<16x32xf32, #tpu.memory_space<vmem>>) attributes {dimension_semantics = [#tpu.dimension_semantics<parallel>, #tpu.dimension_semantics<parallel>, #tpu.dimension_semantics<arbitrary>], iteration_bounds = array<i64: 1, 1, 1>, scalar_prefetch = 0 : i64, scratch_operands = 1 : i64, tpu.core_type = #tpu.core_type<tc>, window_params = [{transform_indices = @transform_0, window_bounds = array<i64: 16, 32>}, {transform_indices = @transform_1, window_bounds = array<i64: 32, 32>}, {transform_indices = @transform_2, window_bounds = array<i64: 1, 32>}, {transform_indices = @transform_3, window_bounds = array<i64: 16, 32>}]} {
    %c0_i32 = arith.constant 0 : i32
    %0 = arith.cmpi eq, %arg2, %c0_i32 : i32
    %1 = arith.extui %0 : i1 to i32
    %c0_i32_0 = arith.constant 0 : i32
    %2 = arith.cmpi ne, %1, %c0_i32_0 : i32
    scf.if %2 {
      %cst_10 = arith.constant 0.000000e+00 : f32
      %12 = vector.broadcast %cst_10 : f32 to vector<16x32xf32>
      %c0_11 = arith.constant 0 : index
      %c0_12 = arith.constant 0 : index
      %13 = vector.load %arg7[%c0_11, %c0_12] : memref<16x32xf32, #tpu.memory_space<vmem>>, vector<16x32xf32>
      tpu.vector_store %arg7[%c0_11, %c0_12], %12 {strides = array<i32>} : memref<16x32xf32, #tpu.memory_space<vmem>>, vector<16x32xf32>,
    } else {
    }
    %c0 = arith.constant 0 : index
    %c0_1 = arith.constant 0 : index
    %3 = vector.load %arg7[%c0, %c0_1] : memref<16x32xf32, #tpu.memory_space<vmem>>, vector<16x32xf32>
    %c0_2 = arith.constant 0 : index
    %c0_3 = arith.constant 0 : index
    %4 = vector.load %arg3[%c0_2, %c0_3] : memref<16x32xbf16, #tpu.memory_space<vmem>>, vector<16x32xbf16>
    %c0_4 = arith.constant 0 : index
    %c0_5 = arith.constant 0 : index
    %5 = vector.load %arg4[%c0_4, %c0_5] : memref<32x32xbf16, #tpu.memory_space<vmem>>, vector<32x32xbf16>
    %cst = arith.constant dense<0.000000e+00> : vector<16x32xf32>
    %6 = tpu.matmul %4, %5, %cst {dimension_numbers = #tpu.dot_dimension_numbers<[1], [0], [0], [1], [0, 0, 1, 1], [], []>} : vector<16x32xbf16>, vector<32x32xbf16>, vector<16x32xf32> -> vector<16x32xf32>
    %7 = arith.addf %3, %6 : vector<16x32xf32>
    %c0_6 = arith.constant 0 : index
    %c0_7 = arith.constant 0 : index
    %8 = vector.load %arg7[%c0_6, %c0_7] : memref<16x32xf32, #tpu.memory_space<vmem>>, vector<16x32xf32>
    tpu.vector_store %arg7[%c0_6, %c0_7], %7 {strides = array<i32>} : memref<16x32xf32, #tpu.memory_space<vmem>>, vector<16x32xf32>,
    %c0_i32_8 = arith.constant 0 : i32
    %9 = arith.cmpi eq, %arg2, %c0_i32_8 : i32
    %10 = arith.extui %9 : i1 to i32
    %c0_i32_9 = arith.constant 0 : i32
    %11 = arith.cmpi ne, %10, %c0_i32_9 : i32
    scf.if %11 {
      %c0_10 = arith.constant 0 : index
      %c0_11 = arith.constant 0 : index
      %12 = vector.load %arg7[%c0_10, %c0_11] : memref<16x32xf32, #tpu.memory_space<vmem>>, vector<16x32xf32>
      %c0_12 = arith.constant 0 : index
      %c0_13 = arith.constant 0 : index
      %13 = vector.load %arg5[%c0_12, %c0_13] : memref<1x32xf32, #tpu.memory_space<vmem>>, vector<1x32xf32>
      %14 = vector.broadcast %13 : vector<1x32xf32> to vector<16x32xf32>
      %15 = arith.addf %12, %14 : vector<16x32xf32>
      %16 = arith.truncf %15 : vector<16x32xf32> to vector<16x32xbf16>
      %c0_14 = arith.constant 0 : index
      %c0_15 = arith.constant 0 : index
      %17 = vector.load %arg6[%c0_14, %c0_15] : memref<16x32xbf16, #tpu.memory_space<vmem>>, vector<16x32xbf16>
      tpu.vector_store %arg6[%c0_14, %c0_15], %16 {strides = array<i32>} : memref<16x32xbf16, #tpu.memory_space<vmem>>, vector<16x32xbf16>,
    } else {
    }
    return
  }
  func.func @transform_0(%arg0: i32, %arg1: i32, %arg2: i32) -> (i32, i32) {
    %c0_i32 = arith.constant 0 : i32
    return %arg0, %arg2 : i32, i32
  }
  func.func @transform_1(%arg0: i32, %arg1: i32, %arg2: i32) -> (i32, i32) {
    %c0_i32 = arith.constant 0 : i32
    return %arg2, %arg1 : i32, i32
  }
  func.func @transform_2(%arg0: i32, %arg1: i32, %arg2: i32) -> (i32, i32) {
    %c0_i32 = arith.constant 0 : i32
    %c0_i32_0 = arith.constant 0 : i32
    return %c0_i32, %arg1 : i32, i32
  }
  func.func @transform_3(%arg0: i32, %arg1: i32, %arg2: i32) -> (i32, i32) {
    %c0_i32 = arith.constant 0 : i32
    return %arg0, %arg1 : i32, i32
  }
}

module attributes {stable_mosaic.version = 11 : i64} {
  func.func @_flash_attn_kernel(%arg0: i32, %arg1: i32, %arg2: i32, %arg3: memref<1x1x8x8xbf16, #tpu.memory_space<vmem>>, %arg4: memref<1x1x8x8xbf16, #tpu.memory_space<vmem>>, %arg5: memref<1x1x8x8xbf16, #tpu.memory_space<vmem>>, %arg6: memref<1x1x8xf32, #tpu.memory_space<vmem>>, %arg7: memref<1x1x8x8xbf16, #tpu.memory_space<vmem>>, %arg8: memref<8x1xf32, #tpu.memory_space<vmem>>, %arg9: memref<8x1xf32, #tpu.memory_space<vmem>>, %arg10: memref<8x8xf32, #tpu.memory_space<vmem>>) attributes {dimension_semantics = [#tpu.dimension_semantics<parallel>, #tpu.dimension_semantics<parallel>, #tpu.dimension_semantics<arbitrary>], iteration_bounds = array<i64: 2, 4, 1>, scalar_prefetch = 0 : i64, scratch_operands = 3 : i64, tpu.core_type = #tpu.core_type<tc>, window_params = [{transform_indices = @transform_0, window_bounds = array<i64: 1, 1, 8, 8>}, {transform_indices = @transform_1, window_bounds = array<i64: 1, 1, 8, 8>}, {transform_indices = @transform_2, window_bounds = array<i64: 1, 1, 8, 8>}, {transform_indices = @transform_3, window_bounds = array<i64: 1, 1, 8>}, {transform_indices = @transform_4, window_bounds = array<i64: 1, 1, 8, 8>}]} {
    %c0_i32 = arith.constant 0 : i32
    %0 = arith.cmpi eq, %arg2, %c0_i32 : i32
    %1 = arith.extui %0 : i1 to i32
    %c0_i32_0 = arith.constant 0 : i32
    %2 = arith.cmpi ne, %1, %c0_i32_0 : i32
    scf.if %2 {
      %cst_33 = arith.constant 0xFF800000 : f32
      %42 = vector.broadcast %cst_33 : f32 to vector<8x1xf32>
      %c0_34 = arith.constant 0 : index
      %c0_35 = arith.constant 0 : index
      %43 = vector.load %arg8[%c0_34, %c0_35] : memref<8x1xf32, #tpu.memory_space<vmem>>, vector<8x1xf32>
      tpu.vector_store %arg8[%c0_34, %c0_35], %42 {strides = array<i32>} : memref<8x1xf32, #tpu.memory_space<vmem>>, vector<8x1xf32>,
      %cst_36 = arith.constant 0.000000e+00 : f32
      %44 = vector.broadcast %cst_36 : f32 to vector<8x1xf32>
      %c0_37 = arith.constant 0 : index
      %c0_38 = arith.constant 0 : index
      %45 = vector.load %arg9[%c0_37, %c0_38] : memref<8x1xf32, #tpu.memory_space<vmem>>, vector<8x1xf32>
      tpu.vector_store %arg9[%c0_37, %c0_38], %44 {strides = array<i32>} : memref<8x1xf32, #tpu.memory_space<vmem>>, vector<8x1xf32>,
      %cst_39 = arith.constant 0.000000e+00 : f32
      %46 = vector.broadcast %cst_39 : f32 to vector<8x8xf32>
      %c0_40 = arith.constant 0 : index
      %c0_41 = arith.constant 0 : index
      %47 = vector.load %arg10[%c0_40, %c0_41] : memref<8x8xf32, #tpu.memory_space<vmem>>, vector<8x8xf32>
      tpu.vector_store %arg10[%c0_40, %c0_41], %46 {strides = array<i32>} : memref<8x8xf32, #tpu.memory_space<vmem>>, vector<8x8xf32>,
    } else {
    }
    %c0 = arith.constant 0 : index
    %c0_1 = arith.constant 0 : index
    %c0_2 = arith.constant 0 : index
    %c0_3 = arith.constant 0 : index
    %3 = vector.load %arg3[%c0, %c0_1, %c0_2, %c0_3] : memref<1x1x8x8xbf16, #tpu.memory_space<vmem>>, vector<1x1x8x8xbf16>
    %4 = vector.shape_cast %3 : vector<1x1x8x8xbf16> to vector<8x8xbf16>
    %c0_4 = arith.constant 0 : index
    %c0_5 = arith.constant 0 : index
    %c0_6 = arith.constant 0 : index
    %c0_7 = arith.constant 0 : index
    %5 = vector.load %arg4[%c0_4, %c0_5, %c0_6, %c0_7] : memref<1x1x8x8xbf16, #tpu.memory_space<vmem>>, vector<1x1x8x8xbf16>
    %6 = vector.shape_cast %5 : vector<1x1x8x8xbf16> to vector<8x8xbf16>
    %cst = arith.constant dense<0.000000e+00> : vector<8x8xf32>
    %7 = tpu.matmul %4, %6, %cst {dimension_numbers = #tpu.dot_dimension_numbers<[1], [0], [0], [1], [0, 0, 1, 1], [], []>} : vector<8x8xbf16>, vector<8x8xbf16>, vector<8x8xf32> -> vector<8x8xf32>
    %cst_8 = arith.constant 0.353553385 : f32
    %8 = vector.broadcast %cst_8 : f32 to vector<8x8xf32>
    %9 = arith.mulf %7, %8 : vector<8x8xf32>
    %c0_9 = arith.constant 0 : index
    %c0_10 = arith.constant 0 : index
    %c0_11 = arith.constant 0 : index
    %10 = vector.load %arg6[%c0_9, %c0_10, %c0_11] : memref<1x1x8xf32, #tpu.memory_space<vmem>>, vector<1x1x8xf32>
    %11 = vector.shape_cast %10 : vector<1x1x8xf32> to vector<1x8xf32>
    %12 = vector.broadcast %11 : vector<1x8xf32> to vector<8x8xf32>
    %13 = arith.addf %9, %12 : vector<8x8xf32>
    %c0_12 = arith.constant 0 : index
    %c0_13 = arith.constant 0 : index
    %14 = vector.load %arg8[%c0_12, %c0_13] : memref<8x1xf32, #tpu.memory_space<vmem>>, vector<8x1xf32>
    %cst_14 = arith.constant dense<0xFF800000> : vector<8xf32>
    %15 = vector.multi_reduction <maximumf>, %13, %cst_14 [1] : vector<8x8xf32> to vector<8xf32>
    %16 = vector.shape_cast %15 : vector<8xf32> to vector<8x1xf32>
    %17 = arith.maximumf %14, %16 : vector<8x1xf32>
    %18 = arith.subf %14, %17 : vector<8x1xf32>
    %19 = math.exp %18 : vector<8x1xf32>
    %20 = vector.broadcast %17 : vector<8x1xf32> to vector<8x8xf32>
    %21 = arith.subf %13, %20 : vector<8x8xf32>
    %22 = math.exp %21 : vector<8x8xf32>
    %c0_15 = arith.constant 0 : index
    %c0_16 = arith.constant 0 : index
    %23 = vector.load %arg9[%c0_15, %c0_16] : memref<8x1xf32, #tpu.memory_space<vmem>>, vector<8x1xf32>
    %24 = arith.mulf %19, %23 : vector<8x1xf32>
    %cst_17 = arith.constant dense<0.000000e+00> : vector<8xf32>
    %25 = vector.multi_reduction <add>, %22, %cst_17 [1] : vector<8x8xf32> to vector<8xf32>
    %26 = vector.shape_cast %25 : vector<8xf32> to vector<8x1xf32>
    %27 = arith.addf %24, %26 : vector<8x1xf32>
    %c0_18 = arith.constant 0 : index
    %c0_19 = arith.constant 0 : index
    %28 = vector.load %arg9[%c0_18, %c0_19] : memref<8x1xf32, #tpu.memory_space<vmem>>, vector<8x1xf32>
    tpu.vector_store %arg9[%c0_18, %c0_19], %27 {strides = array<i32>} : memref<8x1xf32, #tpu.memory_space<vmem>>, vector<8x1xf32>,
    %c0_20 = arith.constant 0 : index
    %c0_21 = arith.constant 0 : index
    %29 = vector.load %arg10[%c0_20, %c0_21] : memref<8x8xf32, #tpu.memory_space<vmem>>, vector<8x8xf32>
    %30 = vector.broadcast %19 : vector<8x1xf32> to vector<8x8xf32>
    %31 = arith.mulf %30, %29 : vector<8x8xf32>
    %32 = arith.truncf %22 : vector<8x8xf32> to vector<8x8xbf16>
    %c0_22 = arith.constant 0 : index
    %c0_23 = arith.constant 0 : index
    %c0_24 = arith.constant 0 : index
    %c0_25 = arith.constant 0 : index
    %33 = vector.load %arg5[%c0_22, %c0_23, %c0_24, %c0_25] : memref<1x1x8x8xbf16, #tpu.memory_space<vmem>>, vector<1x1x8x8xbf16>
    %34 = vector.shape_cast %33 : vector<1x1x8x8xbf16> to vector<8x8xbf16>
    %cst_26 = arith.constant dense<0.000000e+00> : vector<8x8xf32>
    %35 = tpu.matmul %32, %34, %cst_26 {dimension_numbers = #tpu.dot_dimension_numbers<[1], [0], [0], [1], [0, 0, 1, 1], [], []>} : vector<8x8xbf16>, vector<8x8xbf16>, vector<8x8xf32> -> vector<8x8xf32>
    %36 = arith.addf %31, %35 : vector<8x8xf32>
    %c0_27 = arith.constant 0 : index
    %c0_28 = arith.constant 0 : index
    %37 = vector.load %arg10[%c0_27, %c0_28] : memref<8x8xf32, #tpu.memory_space<vmem>>, vector<8x8xf32>
    tpu.vector_store %arg10[%c0_27, %c0_28], %36 {strides = array<i32>} : memref<8x8xf32, #tpu.memory_space<vmem>>, vector<8x8xf32>,
    %c0_29 = arith.constant 0 : index
    %c0_30 = arith.constant 0 : index
    %38 = vector.load %arg8[%c0_29, %c0_30] : memref<8x1xf32, #tpu.memory_space<vmem>>, vector<8x1xf32>
    tpu.vector_store %arg8[%c0_29, %c0_30], %17 {strides = array<i32>} : memref<8x1xf32, #tpu.memory_space<vmem>>, vector<8x1xf32>,
    %c0_i32_31 = arith.constant 0 : i32
    %39 = arith.cmpi eq, %arg2, %c0_i32_31 : i32
    %40 = arith.extui %39 : i1 to i32
    %c0_i32_32 = arith.constant 0 : i32
    %41 = arith.cmpi ne, %40, %c0_i32_32 : i32
    scf.if %41 {
      %c0_33 = arith.constant 0 : index
      %c0_34 = arith.constant 0 : index
      %42 = vector.load %arg10[%c0_33, %c0_34] : memref<8x8xf32, #tpu.memory_space<vmem>>, vector<8x8xf32>
      %c0_35 = arith.constant 0 : index
      %c0_36 = arith.constant 0 : index
      %43 = vector.load %arg9[%c0_35, %c0_36] : memref<8x1xf32, #tpu.memory_space<vmem>>, vector<8x1xf32>
      %44 = tpu.reciprocal %43 {approx = true} : vector<8x1xf32> -> vector<8x1xf32>
      %45 = vector.broadcast %44 : vector<8x1xf32> to vector<8x8xf32>
      %46 = arith.mulf %42, %45 : vector<8x8xf32>
      %47 = arith.truncf %46 : vector<8x8xf32> to vector<8x8xbf16>
      %c0_37 = arith.constant 0 : index
      %c0_38 = arith.constant 0 : index
      %c0_39 = arith.constant 0 : index
      %c0_40 = arith.constant 0 : index
      %48 = vector.load %arg7[%c0_37, %c0_38, %c0_39, %c0_40] : memref<1x1x8x8xbf16, #tpu.memory_space<vmem>>, vector<1x1x8x8xbf16>
      %49 = vector.shape_cast %48 : vector<1x1x8x8xbf16> to vector<8x8xbf16>
      %50 = vector.shape_cast %47 : vector<8x8xbf16> to vector<1x1x8x8xbf16>
      tpu.vector_store %arg7[%c0_37, %c0_38, %c0_39, %c0_40], %50 {strides = array<i32>} : memref<1x1x8x8xbf16, #tpu.memory_space<vmem>>, vector<1x1x8x8xbf16>,
    } else {
    }
    return
  }
  func.func @transform_0(%arg0: i32, %arg1: i32, %arg2: i32) -> (i32, i32, i32, i32) {
    %c0_i32 = arith.constant 0 : i32
    %c0_i32_0 = arith.constant 0 : i32
    %c0_i32_1 = arith.constant 0 : i32
    return %arg0, %arg1, %c0_i32, %c0_i32_0 : i32, i32, i32, i32
  }
  func.func @transform_1(%arg0: i32, %arg1: i32, %arg2: i32) -> (i32, i32, i32, i32) {
    %c0_i32 = arith.constant 0 : i32
    %c0_i32_0 = arith.constant 0 : i32
    return %arg0, %arg1, %c0_i32, %arg2 : i32, i32, i32, i32
  }
  func.func @transform_2(%arg0: i32, %arg1: i32, %arg2: i32) -> (i32, i32, i32, i32) {
    %c0_i32 = arith.constant 0 : i32
    %c0_i32_0 = arith.constant 0 : i32
    return %arg0, %arg1, %arg2, %c0_i32 : i32, i32, i32, i32
  }
  func.func @transform_3(%arg0: i32, %arg1: i32, %arg2: i32) -> (i32, i32, i32) {
    %c0_i32 = arith.constant 0 : i32
    %c0_i32_0 = arith.constant 0 : i32
    return %arg0, %c0_i32, %arg2 : i32, i32, i32
  }
  func.func @transform_4(%arg0: i32, %arg1: i32, %arg2: i32) -> (i32, i32, i32, i32) {
    %c0_i32 = arith.constant 0 : i32
    %c0_i32_0 = arith.constant 0 : i32
    %c0_i32_1 = arith.constant 0 : i32
    return %arg0, %arg1, %c0_i32, %c0_i32_0 : i32, i32, i32, i32
  }
}

module attributes {stable_mosaic.version = 11 : i64} {
  func.func @_ln_kernel(%arg0: i32, %arg1: memref<16x32xbf16, #tpu.memory_space<vmem>>, %arg2: memref<1x32xf32, #tpu.memory_space<vmem>>, %arg3: memref<1x32xf32, #tpu.memory_space<vmem>>, %arg4: memref<16x32xbf16, #tpu.memory_space<vmem>>) attributes {dimension_semantics = [#tpu.dimension_semantics<parallel>], iteration_bounds = array<i64: 1>, scalar_prefetch = 0 : i64, scratch_operands = 0 : i64, tpu.core_type = #tpu.core_type<tc>, window_params = [{transform_indices = @transform_0, window_bounds = array<i64: 16, 32>}, {pipeline_mode = #tpu.pipeline_mode<synchronous>, transform_indices = @transform_1, window_bounds = array<i64: 1, 32>}, {pipeline_mode = #tpu.pipeline_mode<synchronous>, transform_indices = @transform_2, window_bounds = array<i64: 1, 32>}, {transform_indices = @transform_3, window_bounds = array<i64: 16, 32>}]} {
    %c0 = arith.constant 0 : index
    %c0_0 = arith.constant 0 : index
    %0 = vector.load %arg1[%c0, %c0_0] : memref<16x32xbf16, #tpu.memory_space<vmem>>, vector<16x32xbf16>
    %1 = arith.extf %0 : vector<16x32xbf16> to vector<16x32xf32>
    %cst = arith.constant dense<0.000000e+00> : vector<16xf32>
    %2 = vector.multi_reduction <add>, %1, %cst [1] : vector<16x32xf32> to vector<16xf32>
    %3 = vector.shape_cast %2 : vector<16xf32> to vector<16x1xf32>
    %cst_1 = arith.constant 3.200000e+01 : f32
    %4 = vector.broadcast %cst_1 : f32 to vector<16x1xf32>
    %5 = arith.divf %3, %4 : vector<16x1xf32>
    %6 = vector.broadcast %5 : vector<16x1xf32> to vector<16x32xf32>
    %7 = arith.subf %1, %6 : vector<16x32xf32>
    %8 = arith.mulf %7, %7 : vector<16x32xf32>
    %cst_2 = arith.constant dense<0.000000e+00> : vector<16xf32>
    %9 = vector.multi_reduction <add>, %8, %cst_2 [1] : vector<16x32xf32> to vector<16xf32>
    %10 = vector.shape_cast %9 : vector<16xf32> to vector<16x1xf32>
    %cst_3 = arith.constant 3.200000e+01 : f32
    %11 = vector.broadcast %cst_3 : f32 to vector<16x1xf32>
    %12 = arith.divf %10, %11 : vector<16x1xf32>
    %cst_4 = arith.constant 9.99999974E-6 : f32
    %13 = vector.broadcast %cst_4 : f32 to vector<16x1xf32>
    %14 = arith.addf %12, %13 : vector<16x1xf32>
    %15 = math.rsqrt %14 : vector<16x1xf32>
    %16 = vector.broadcast %15 : vector<16x1xf32> to vector<16x32xf32>
    %17 = arith.mulf %7, %16 : vector<16x32xf32>
    %c0_5 = arith.constant 0 : index
    %c0_6 = arith.constant 0 : index
    %18 = vector.load %arg2[%c0_5, %c0_6] : memref<1x32xf32, #tpu.memory_space<vmem>>, vector<1x32xf32>
    %19 = vector.broadcast %18 : vector<1x32xf32> to vector<16x32xf32>
    %20 = arith.mulf %17, %19 : vector<16x32xf32>
    %c0_7 = arith.constant 0 : index
    %c0_8 = arith.constant 0 : index
    %21 = vector.load %arg3[%c0_7, %c0_8] : memref<1x32xf32, #tpu.memory_space<vmem>>, vector<1x32xf32>
    %22 = vector.broadcast %21 : vector<1x32xf32> to vector<16x32xf32>
    %23 = arith.addf %20, %22 : vector<16x32xf32>
    %24 = arith.truncf %23 : vector<16x32xf32> to vector<16x32xbf16>
    %c0_9 = arith.constant 0 : index
    %c0_10 = arith.constant 0 : index
    %25 = vector.load %arg4[%c0_9, %c0_10] : memref<16x32xbf16, #tpu.memory_space<vmem>>, vector<16x32xbf16>
    tpu.vector_store %arg4[%c0_9, %c0_10], %24 {strides = array<i32>} : memref<16x32xbf16, #tpu.memory_space<vmem>>, vector<16x32xbf16>,
    return
  }
  func.func @transform_0(%arg0: i32) -> (i32, i32) {
    %c0_i32 = arith.constant 0 : i32
    %c0_i32_0 = arith.constant 0 : i32
    return %arg0, %c0_i32 : i32, i32
  }
  func.func @transform_1(%arg0: i32) -> (i32, i32) {
    %c0_i32 = arith.constant 0 : i32
    %c0_i32_0 = arith.constant 0 : i32
    %c0_i32_1 = arith.constant 0 : i32
    return %c0_i32, %c0_i32_0 : i32, i32
  }
  func.func @transform_2(%arg0: i32) -> (i32, i32) {
    %c0_i32 = arith.constant 0 : i32
    %c0_i32_0 = arith.constant 0 : i32
    %c0_i32_1 = arith.constant 0 : i32
    return %c0_i32, %c0_i32_0 : i32, i32
  }
  func.func @transform_3(%arg0: i32) -> (i32, i32) {
    %c0_i32 = arith.constant 0 : i32
    %c0_i32_0 = arith.constant 0 : i32
    return %arg0, %c0_i32 : i32, i32
  }
}

module attributes {stable_mosaic.version = 11 : i64} {
  func.func @_ffn_ln_kernel(%arg0: i32, %arg1: memref<16x32xbf16, #tpu.memory_space<vmem>>, %arg2: memref<32x64xbf16, #tpu.memory_space<vmem>>, %arg3: memref<1x64xf32, #tpu.memory_space<vmem>>, %arg4: memref<64x32xbf16, #tpu.memory_space<vmem>>, %arg5: memref<1x32xf32, #tpu.memory_space<vmem>>, %arg6: memref<1x32xf32, #tpu.memory_space<vmem>>, %arg7: memref<1x32xf32, #tpu.memory_space<vmem>>, %arg8: memref<16x32xbf16, #tpu.memory_space<vmem>>) attributes {dimension_semantics = [#tpu.dimension_semantics<parallel>], iteration_bounds = array<i64: 1>, scalar_prefetch = 0 : i64, scratch_operands = 0 : i64, tpu.core_type = #tpu.core_type<tc>, window_params = [{transform_indices = @transform_0, window_bounds = array<i64: 16, 32>}, {pipeline_mode = #tpu.pipeline_mode<synchronous>, transform_indices = @transform_1, window_bounds = array<i64: 32, 64>}, {pipeline_mode = #tpu.pipeline_mode<synchronous>, transform_indices = @transform_2, window_bounds = array<i64: 1, 64>}, {pipeline_mode = #tpu.pipeline_mode<synchronous>, transform_indices = @transform_3, window_bounds = array<i64: 64, 32>}, {pipeline_mode = #tpu.pipeline_mode<synchronous>, transform_indices = @transform_4, window_bounds = array<i64: 1, 32>}, {pipeline_mode = #tpu.pipeline_mode<synchronous>, transform_indices = @transform_5, window_bounds = array<i64: 1, 32>}, {pipeline_mode = #tpu.pipeline_mode<synchronous>, transform_indices = @transform_6, window_bounds = array<i64: 1, 32>}, {transform_indices = @transform_7, window_bounds = array<i64: 16, 32>}]} {
    %c0 = arith.constant 0 : index
    %c0_0 = arith.constant 0 : index
    %0 = vector.load %arg1[%c0, %c0_0] : memref<16x32xbf16, #tpu.memory_space<vmem>>, vector<16x32xbf16>
    %c0_1 = arith.constant 0 : index
    %c0_2 = arith.constant 0 : index
    %1 = vector.load %arg2[%c0_1, %c0_2] : memref<32x64xbf16, #tpu.memory_space<vmem>>, vector<32x64xbf16>
    %cst = arith.constant dense<0.000000e+00> : vector<16x64xf32>
    %2 = tpu.matmul %0, %1, %cst {dimension_numbers = #tpu.dot_dimension_numbers<[1], [0], [0], [1], [0, 0, 1, 1], [], []>} : vector<16x32xbf16>, vector<32x64xbf16>, vector<16x64xf32> -> vector<16x64xf32>
    %c0_3 = arith.constant 0 : index
    %c0_4 = arith.constant 0 : index
    %3 = vector.load %arg3[%c0_3, %c0_4] : memref<1x64xf32, #tpu.memory_space<vmem>>, vector<1x64xf32>
    %4 = vector.broadcast %3 : vector<1x64xf32> to vector<16x64xf32>
    %5 = arith.addf %2, %4 : vector<16x64xf32>
    %cst_5 = arith.constant 0.000000e+00 : f32
    %6 = vector.broadcast %cst_5 : f32 to vector<16x64xf32>
    %7 = arith.maximumf %5, %6 : vector<16x64xf32>
    %8 = arith.truncf %7 : vector<16x64xf32> to vector<16x64xbf16>
    %c0_6 = arith.constant 0 : index
    %c0_7 = arith.constant 0 : index
    %9 = vector.load %arg4[%c0_6, %c0_7] : memref<64x32xbf16, #tpu.memory_space<vmem>>, vector<64x32xbf16>
    %cst_8 = arith.constant dense<0.000000e+00> : vector<16x32xf32>
    %10 = tpu.matmul %8, %9, %cst_8 {dimension_numbers = #tpu.dot_dimension_numbers<[1], [0], [0], [1], [0, 0, 1, 1], [], []>} : vector<16x64xbf16>, vector<64x32xbf16>, vector<16x32xf32> -> vector<16x32xf32>
    %c0_9 = arith.constant 0 : index
    %c0_10 = arith.constant 0 : index
    %11 = vector.load %arg5[%c0_9, %c0_10] : memref<1x32xf32, #tpu.memory_space<vmem>>, vector<1x32xf32>
    %12 = vector.broadcast %11 : vector<1x32xf32> to vector<16x32xf32>
    %13 = arith.addf %10, %12 : vector<16x32xf32>
    %14 = arith.extf %0 : vector<16x32xbf16> to vector<16x32xf32>
    %15 = arith.addf %14, %13 : vector<16x32xf32>
    %cst_11 = arith.constant dense<0.000000e+00> : vector<16xf32>
    %16 = vector.multi_reduction <add>, %15, %cst_11 [1] : vector<16x32xf32> to vector<16xf32>
    %17 = vector.shape_cast %16 : vector<16xf32> to vector<16x1xf32>
    %cst_12 = arith.constant 3.200000e+01 : f32
    %18 = vector.broadcast %cst_12 : f32 to vector<16x1xf32>
    %19 = arith.divf %17, %18 : vector<16x1xf32>
    %20 = vector.broadcast %19 : vector<16x1xf32> to vector<16x32xf32>
    %21 = arith.subf %15, %20 : vector<16x32xf32>
    %22 = arith.mulf %21, %21 : vector<16x32xf32>
    %cst_13 = arith.constant dense<0.000000e+00> : vector<16xf32>
    %23 = vector.multi_reduction <add>, %22, %cst_13 [1] : vector<16x32xf32> to vector<16xf32>
    %24 = vector.shape_cast %23 : vector<16xf32> to vector<16x1xf32>
    %cst_14 = arith.constant 3.200000e+01 : f32
    %25 = vector.broadcast %cst_14 : f32 to vector<16x1xf32>
    %26 = arith.divf %24, %25 : vector<16x1xf32>
    %cst_15 = arith.constant 9.99999974E-6 : f32
    %27 = vector.broadcast %cst_15 : f32 to vector<16x1xf32>
    %28 = arith.addf %26, %27 : vector<16x1xf32>
    %29 = math.rsqrt %28 : vector<16x1xf32>
    %30 = vector.broadcast %29 : vector<16x1xf32> to vector<16x32xf32>
    %31 = arith.mulf %21, %30 : vector<16x32xf32>
    %c0_16 = arith.constant 0 : index
    %c0_17 = arith.constant 0 : index
    %32 = vector.load %arg6[%c0_16, %c0_17] : memref<1x32xf32, #tpu.memory_space<vmem>>, vector<1x32xf32>
    %33 = vector.broadcast %32 : vector<1x32xf32> to vector<16x32xf32>
    %34 = arith.mulf %31, %33 : vector<16x32xf32>
    %c0_18 = arith.constant 0 : index
    %c0_19 = arith.constant 0 : index
    %35 = vector.load %arg7[%c0_18, %c0_19] : memref<1x32xf32, #tpu.memory_space<vmem>>, vector<1x32xf32>
    %36 = vector.broadcast %35 : vector<1x32xf32> to vector<16x32xf32>
    %37 = arith.addf %34, %36 : vector<16x32xf32>
    %38 = arith.truncf %37 : vector<16x32xf32> to vector<16x32xbf16>
    %c0_20 = arith.constant 0 : index
    %c0_21 = arith.constant 0 : index
    %39 = vector.load %arg8[%c0_20, %c0_21] : memref<16x32xbf16, #tpu.memory_space<vmem>>, vector<16x32xbf16>
    tpu.vector_store %arg8[%c0_20, %c0_21], %38 {strides = array<i32>} : memref<16x32xbf16, #tpu.memory_space<vmem>>, vector<16x32xbf16>,
    return
  }
  func.func @transform_0(%arg0: i32) -> (i32, i32) {
    %c0_i32 = arith.constant 0 : i32
    %c0_i32_0 = arith.constant 0 : i32
    return %arg0, %c0_i32 : i32, i32
  }
  func.func @transform_1(%arg0: i32) -> (i32, i32) {
    %c0_i32 = arith.constant 0 : i32
    %c0_i32_0 = arith.constant 0 : i32
    %c0_i32_1 = arith.constant 0 : i32
    return %c0_i32, %c0_i32_0 : i32, i32
  }
  func.func @transform_2(%arg0: i32) -> (i32, i32) {
    %c0_i32 = arith.constant 0 : i32
    %c0_i32_0 = arith.constant 0 : i32
    %c0_i32_1 = arith.constant 0 : i32
    return %c0_i32, %c0_i32_0 : i32, i32
  }
  func.func @transform_3(%arg0: i32) -> (i32, i32) {
    %c0_i32 = arith.constant 0 : i32
    %c0_i32_0 = arith.constant 0 : i32
    %c0_i32_1 = arith.constant 0 : i32
    return %c0_i32, %c0_i32_0 : i32, i32
  }
  func.func @transform_4(%arg0: i32) -> (i32, i32) {
    %c0_i32 = arith.constant 0 : i32
    %c0_i32_0 = arith.constant 0 : i32
    %c0_i32_1 = arith.constant 0 : i32
    return %c0_i32, %c0_i32_0 : i32, i32
  }
  func.func @transform_5(%arg0: i32) -> (i32, i32) {
    %c0_i32 = arith.constant 0 : i32
    %c0_i32_0 = arith.constant 0 : i32
    %c0_i32_1 = arith.constant 0 : i32
    return %c0_i32, %c0_i32_0 : i32, i32
  }
  func.func @transform_6(%arg0: i32) -> (i32, i32) {
    %c0_i32 = arith.constant 0 : i32
    %c0_i32_0 = arith.constant 0 : i32
    %c0_i32_1 = arith.constant 0 : i32
    return %c0_i32, %c0_i32_0 : i32, i32
  }
  func.func @transform_7(%arg0: i32) -> (i32, i32) {
    %c0_i32 = arith.constant 0 : i32
    %c0_i32_0 = arith.constant 0 : i32
    return %arg0, %c0_i32 : i32, i32
  }
}

module attributes {stable_mosaic.version = 11 : i64} {
  func.func @_matmul_kernel(%arg0: i32, %arg1: i32, %arg2: i32, %arg3: memref<16x32xbf16, #tpu.memory_space<vmem>>, %arg4: memref<32x64xbf16, #tpu.memory_space<vmem>>, %arg5: memref<1x64xf32, #tpu.memory_space<vmem>>, %arg6: memref<16x64xbf16, #tpu.memory_space<vmem>>, %arg7: memref<16x64xf32, #tpu.memory_space<vmem>>) attributes {dimension_semantics = [#tpu.dimension_semantics<parallel>, #tpu.dimension_semantics<parallel>, #tpu.dimension_semantics<arbitrary>], iteration_bounds = array<i64: 1, 1, 1>, scalar_prefetch = 0 : i64, scratch_operands = 1 : i64, tpu.core_type = #tpu.core_type<tc>, window_params = [{transform_indices = @transform_0, window_bounds = array<i64: 16, 32>}, {transform_indices = @transform_1, window_bounds = array<i64: 32, 64>}, {transform_indices = @transform_2, window_bounds = array<i64: 1, 64>}, {transform_indices = @transform_3, window_bounds = array<i64: 16, 64>}]} {
    %c0_i32 = arith.constant 0 : i32
    %0 = arith.cmpi eq, %arg2, %c0_i32 : i32
    %1 = arith.extui %0 : i1 to i32
    %c0_i32_0 = arith.constant 0 : i32
    %2 = arith.cmpi ne, %1, %c0_i32_0 : i32
    scf.if %2 {
      %cst_10 = arith.constant 0.000000e+00 : f32
      %12 = vector.broadcast %cst_10 : f32 to vector<16x64xf32>
      %c0_11 = arith.constant 0 : index
      %c0_12 = arith.constant 0 : index
      %13 = vector.load %arg7[%c0_11, %c0_12] : memref<16x64xf32, #tpu.memory_space<vmem>>, vector<16x64xf32>
      tpu.vector_store %arg7[%c0_11, %c0_12], %12 {strides = array<i32>} : memref<16x64xf32, #tpu.memory_space<vmem>>, vector<16x64xf32>,
    } else {
    }
    %c0 = arith.constant 0 : index
    %c0_1 = arith.constant 0 : index
    %3 = vector.load %arg7[%c0, %c0_1] : memref<16x64xf32, #tpu.memory_space<vmem>>, vector<16x64xf32>
    %c0_2 = arith.constant 0 : index
    %c0_3 = arith.constant 0 : index
    %4 = vector.load %arg3[%c0_2, %c0_3] : memref<16x32xbf16, #tpu.memory_space<vmem>>, vector<16x32xbf16>
    %c0_4 = arith.constant 0 : index
    %c0_5 = arith.constant 0 : index
    %5 = vector.load %arg4[%c0_4, %c0_5] : memref<32x64xbf16, #tpu.memory_space<vmem>>, vector<32x64xbf16>
    %cst = arith.constant dense<0.000000e+00> : vector<16x64xf32>
    %6 = tpu.matmul %4, %5, %cst {dimension_numbers = #tpu.dot_dimension_numbers<[1], [0], [0], [1], [0, 0, 1, 1], [], []>} : vector<16x32xbf16>, vector<32x64xbf16>, vector<16x64xf32> -> vector<16x64xf32>
    %7 = arith.addf %3, %6 : vector<16x64xf32>
    %c0_6 = arith.constant 0 : index
    %c0_7 = arith.constant 0 : index
    %8 = vector.load %arg7[%c0_6, %c0_7] : memref<16x64xf32, #tpu.memory_space<vmem>>, vector<16x64xf32>
    tpu.vector_store %arg7[%c0_6, %c0_7], %7 {strides = array<i32>} : memref<16x64xf32, #tpu.memory_space<vmem>>, vector<16x64xf32>,
    %c0_i32_8 = arith.constant 0 : i32
    %9 = arith.cmpi eq, %arg2, %c0_i32_8 : i32
    %10 = arith.extui %9 : i1 to i32
    %c0_i32_9 = arith.constant 0 : i32
    %11 = arith.cmpi ne, %10, %c0_i32_9 : i32
    scf.if %11 {
      %c0_10 = arith.constant 0 : index
      %c0_11 = arith.constant 0 : index
      %12 = vector.load %arg7[%c0_10, %c0_11] : memref<16x64xf32, #tpu.memory_space<vmem>>, vector<16x64xf32>
      %c0_12 = arith.constant 0 : index
      %c0_13 = arith.constant 0 : index
      %13 = vector.load %arg5[%c0_12, %c0_13] : memref<1x64xf32, #tpu.memory_space<vmem>>, vector<1x64xf32>
      %14 = vector.broadcast %13 : vector<1x64xf32> to vector<16x64xf32>
      %15 = arith.addf %12, %14 : vector<16x64xf32>
      %16 = arith.truncf %15 : vector<16x64xf32> to vector<16x64xbf16>
      %c0_14 = arith.constant 0 : index
      %c0_15 = arith.constant 0 : index
      %17 = vector.load %arg6[%c0_14, %c0_15] : memref<16x64xbf16, #tpu.memory_space<vmem>>, vector<16x64xbf16>
      tpu.vector_store %arg6[%c0_14, %c0_15], %16 {strides = array<i32>} : memref<16x64xbf16, #tpu.memory_space<vmem>>, vector<16x64xbf16>,
    } else {
    }
    return
  }
  func.func @transform_0(%arg0: i32, %arg1: i32, %arg2: i32) -> (i32, i32) {
    %c0_i32 = arith.constant 0 : i32
    return %arg0, %arg2 : i32, i32
  }
  func.func @transform_1(%arg0: i32, %arg1: i32, %arg2: i32) -> (i32, i32) {
    %c0_i32 = arith.constant 0 : i32
    return %arg2, %arg1 : i32, i32
  }
  func.func @transform_2(%arg0: i32, %arg1: i32, %arg2: i32) -> (i32, i32) {
    %c0_i32 = arith.constant 0 : i32
    %c0_i32_0 = arith.constant 0 : i32
    return %c0_i32, %arg1 : i32, i32
  }
  func.func @transform_3(%arg0: i32, %arg1: i32, %arg2: i32) -> (i32, i32) {
    %c0_i32 = arith.constant 0 : i32
    return %arg0, %arg1 : i32, i32
  }
}

module attributes {stable_mosaic.version = 11 : i64} {
  func.func @_flash_attn_kernel(%arg0: i32, %arg1: i32, %arg2: i32, %arg3: memref<1x1x8x8xbf16, #tpu.memory_space<vmem>>, %arg4: memref<1x1x8x8xbf16, #tpu.memory_space<vmem>>, %arg5: memref<1x1x8x8xbf16, #tpu.memory_space<vmem>>, %arg6: memref<1x1x8x8xbf16, #tpu.memory_space<vmem>>, %arg7: memref<8x1xf32, #tpu.memory_space<vmem>>, %arg8: memref<8x1xf32, #tpu.memory_space<vmem>>, %arg9: memref<8x8xf32, #tpu.memory_space<vmem>>) attributes {dimension_semantics = [#tpu.dimension_semantics<parallel>, #tpu.dimension_semantics<parallel>, #tpu.dimension_semantics<arbitrary>], iteration_bounds = array<i64: 2, 4, 1>, scalar_prefetch = 0 : i64, scratch_operands = 3 : i64, tpu.core_type = #tpu.core_type<tc>, window_params = [{transform_indices = @transform_0, window_bounds = array<i64: 1, 1, 8, 8>}, {transform_indices = @transform_1, window_bounds = array<i64: 1, 1, 8, 8>}, {transform_indices = @transform_2, window_bounds = array<i64: 1, 1, 8, 8>}, {transform_indices = @transform_3, window_bounds = array<i64: 1, 1, 8, 8>}]} {
    %c0_i32 = arith.constant 0 : i32
    %0 = arith.cmpi eq, %arg2, %c0_i32 : i32
    %1 = arith.extui %0 : i1 to i32
    %c0_i32_0 = arith.constant 0 : i32
    %2 = arith.cmpi ne, %1, %c0_i32_0 : i32
    scf.if %2 {
      %cst_30 = arith.constant 0xFF800000 : f32
      %38 = vector.broadcast %cst_30 : f32 to vector<8x1xf32>
      %c0_31 = arith.constant 0 : index
      %c0_32 = arith.constant 0 : index
      %39 = vector.load %arg7[%c0_31, %c0_32] : memref<8x1xf32, #tpu.memory_space<vmem>>, vector<8x1xf32>
      tpu.vector_store %arg7[%c0_31, %c0_32], %38 {strides = array<i32>} : memref<8x1xf32, #tpu.memory_space<vmem>>, vector<8x1xf32>,
      %cst_33 = arith.constant 0.000000e+00 : f32
      %40 = vector.broadcast %cst_33 : f32 to vector<8x1xf32>
      %c0_34 = arith.constant 0 : index
      %c0_35 = arith.constant 0 : index
      %41 = vector.load %arg8[%c0_34, %c0_35] : memref<8x1xf32, #tpu.memory_space<vmem>>, vector<8x1xf32>
      tpu.vector_store %arg8[%c0_34, %c0_35], %40 {strides = array<i32>} : memref<8x1xf32, #tpu.memory_space<vmem>>, vector<8x1xf32>,
      %cst_36 = arith.constant 0.000000e+00 : f32
      %42 = vector.broadcast %cst_36 : f32 to vector<8x8xf32>
      %c0_37 = arith.constant 0 : index
      %c0_38 = arith.constant 0 : index
      %43 = vector.load %arg9[%c0_37, %c0_38] : memref<8x8xf32, #tpu.memory_space<vmem>>, vector<8x8xf32>
      tpu.vector_store %arg9[%c0_37, %c0_38], %42 {strides = array<i32>} : memref<8x8xf32, #tpu.memory_space<vmem>>, vector<8x8xf32>,
    } else {
    }
    %c0 = arith.constant 0 : index
    %c0_1 = arith.constant 0 : index
    %c0_2 = arith.constant 0 : index
    %c0_3 = arith.constant 0 : index
    %3 = vector.load %arg3[%c0, %c0_1, %c0_2, %c0_3] : memref<1x1x8x8xbf16, #tpu.memory_space<vmem>>, vector<1x1x8x8xbf16>
    %4 = vector.shape_cast %3 : vector<1x1x8x8xbf16> to vector<8x8xbf16>
    %c0_4 = arith.constant 0 : index
    %c0_5 = arith.constant 0 : index
    %c0_6 = arith.constant 0 : index
    %c0_7 = arith.constant 0 : index
    %5 = vector.load %arg4[%c0_4, %c0_5, %c0_6, %c0_7] : memref<1x1x8x8xbf16, #tpu.memory_space<vmem>>, vector<1x1x8x8xbf16>
    %6 = vector.shape_cast %5 : vector<1x1x8x8xbf16> to vector<8x8xbf16>
    %cst = arith.constant dense<0.000000e+00> : vector<8x8xf32>
    %7 = tpu.matmul %4, %6, %cst {dimension_numbers = #tpu.dot_dimension_numbers<[1], [0], [0], [1], [0, 0, 1, 1], [], []>} : vector<8x8xbf16>, vector<8x8xbf16>, vector<8x8xf32> -> vector<8x8xf32>
    %cst_8 = arith.constant 0.353553385 : f32
    %8 = vector.broadcast %cst_8 : f32 to vector<8x8xf32>
    %9 = arith.mulf %7, %8 : vector<8x8xf32>
    %c0_9 = arith.constant 0 : index
    %c0_10 = arith.constant 0 : index
    %10 = vector.load %arg7[%c0_9, %c0_10] : memref<8x1xf32, #tpu.memory_space<vmem>>, vector<8x1xf32>
    %cst_11 = arith.constant dense<0xFF800000> : vector<8xf32>
    %11 = vector.multi_reduction <maximumf>, %9, %cst_11 [1] : vector<8x8xf32> to vector<8xf32>
    %12 = vector.shape_cast %11 : vector<8xf32> to vector<8x1xf32>
    %13 = arith.maximumf %10, %12 : vector<8x1xf32>
    %14 = arith.subf %10, %13 : vector<8x1xf32>
    %15 = math.exp %14 : vector<8x1xf32>
    %16 = vector.broadcast %13 : vector<8x1xf32> to vector<8x8xf32>
    %17 = arith.subf %9, %16 : vector<8x8xf32>
    %18 = math.exp %17 : vector<8x8xf32>
    %c0_12 = arith.constant 0 : index
    %c0_13 = arith.constant 0 : index
    %19 = vector.load %arg8[%c0_12, %c0_13] : memref<8x1xf32, #tpu.memory_space<vmem>>, vector<8x1xf32>
    %20 = arith.mulf %15, %19 : vector<8x1xf32>
    %cst_14 = arith.constant dense<0.000000e+00> : vector<8xf32>
    %21 = vector.multi_reduction <add>, %18, %cst_14 [1] : vector<8x8xf32> to vector<8xf32>
    %22 = vector.shape_cast %21 : vector<8xf32> to vector<8x1xf32>
    %23 = arith.addf %20, %22 : vector<8x1xf32>
    %c0_15 = arith.constant 0 : index
    %c0_16 = arith.constant 0 : index
    %24 = vector.load %arg8[%c0_15, %c0_16] : memref<8x1xf32, #tpu.memory_space<vmem>>, vector<8x1xf32>
    tpu.vector_store %arg8[%c0_15, %c0_16], %23 {strides = array<i32>} : memref<8x1xf32, #tpu.memory_space<vmem>>, vector<8x1xf32>,
    %c0_17 = arith.constant 0 : index
    %c0_18 = arith.constant 0 : index
    %25 = vector.load %arg9[%c0_17, %c0_18] : memref<8x8xf32, #tpu.memory_space<vmem>>, vector<8x8xf32>
    %26 = vector.broadcast %15 : vector<8x1xf32> to vector<8x8xf32>
    %27 = arith.mulf %26, %25 : vector<8x8xf32>
    %28 = arith.truncf %18 : vector<8x8xf32> to vector<8x8xbf16>
    %c0_19 = arith.constant 0 : index
    %c0_20 = arith.constant 0 : index
    %c0_21 = arith.constant 0 : index
    %c0_22 = arith.constant 0 : index
    %29 = vector.load %arg5[%c0_19, %c0_20, %c0_21, %c0_22] : memref<1x1x8x8xbf16, #tpu.memory_space<vmem>>, vector<1x1x8x8xbf16>
    %30 = vector.shape_cast %29 : vector<1x1x8x8xbf16> to vector<8x8xbf16>
    %cst_23 = arith.constant dense<0.000000e+00> : vector<8x8xf32>
    %31 = tpu.matmul %28, %30, %cst_23 {dimension_numbers = #tpu.dot_dimension_numbers<[1], [0], [0], [1], [0, 0, 1, 1], [], []>} : vector<8x8xbf16>, vector<8x8xbf16>, vector<8x8xf32> -> vector<8x8xf32>
    %32 = arith.addf %27, %31 : vector<8x8xf32>
    %c0_24 = arith.constant 0 : index
    %c0_25 = arith.constant 0 : index
    %33 = vector.load %arg9[%c0_24, %c0_25] : memref<8x8xf32, #tpu.memory_space<vmem>>, vector<8x8xf32>
    tpu.vector_store %arg9[%c0_24, %c0_25], %32 {strides = array<i32>} : memref<8x8xf32, #tpu.memory_space<vmem>>, vector<8x8xf32>,
    %c0_26 = arith.constant 0 : index
    %c0_27 = arith.constant 0 : index
    %34 = vector.load %arg7[%c0_26, %c0_27] : memref<8x1xf32, #tpu.memory_space<vmem>>, vector<8x1xf32>
    tpu.vector_store %arg7[%c0_26, %c0_27], %13 {strides = array<i32>} : memref<8x1xf32, #tpu.memory_space<vmem>>, vector<8x1xf32>,
    %c0_i32_28 = arith.constant 0 : i32
    %35 = arith.cmpi eq, %arg2, %c0_i32_28 : i32
    %36 = arith.extui %35 : i1 to i32
    %c0_i32_29 = arith.constant 0 : i32
    %37 = arith.cmpi ne, %36, %c0_i32_29 : i32
    scf.if %37 {
      %c0_30 = arith.constant 0 : index
      %c0_31 = arith.constant 0 : index
      %38 = vector.load %arg9[%c0_30, %c0_31] : memref<8x8xf32, #tpu.memory_space<vmem>>, vector<8x8xf32>
      %c0_32 = arith.constant 0 : index
      %c0_33 = arith.constant 0 : index
      %39 = vector.load %arg8[%c0_32, %c0_33] : memref<8x1xf32, #tpu.memory_space<vmem>>, vector<8x1xf32>
      %40 = tpu.reciprocal %39 {approx = true} : vector<8x1xf32> -> vector<8x1xf32>
      %41 = vector.broadcast %40 : vector<8x1xf32> to vector<8x8xf32>
      %42 = arith.mulf %38, %41 : vector<8x8xf32>
      %43 = arith.truncf %42 : vector<8x8xf32> to vector<8x8xbf16>
      %c0_34 = arith.constant 0 : index
      %c0_35 = arith.constant 0 : index
      %c0_36 = arith.constant 0 : index
      %c0_37 = arith.constant 0 : index
      %44 = vector.load %arg6[%c0_34, %c0_35, %c0_36, %c0_37] : memref<1x1x8x8xbf16, #tpu.memory_space<vmem>>, vector<1x1x8x8xbf16>
      %45 = vector.shape_cast %44 : vector<1x1x8x8xbf16> to vector<8x8xbf16>
      %46 = vector.shape_cast %43 : vector<8x8xbf16> to vector<1x1x8x8xbf16>
      tpu.vector_store %arg6[%c0_34, %c0_35, %c0_36, %c0_37], %46 {strides = array<i32>} : memref<1x1x8x8xbf16, #tpu.memory_space<vmem>>, vector<1x1x8x8xbf16>,
    } else {
    }
    return
  }
  func.func @transform_0(%arg0: i32, %arg1: i32, %arg2: i32) -> (i32, i32, i32, i32) {
    %c0_i32 = arith.constant 0 : i32
    %c0_i32_0 = arith.constant 0 : i32
    %c0_i32_1 = arith.constant 0 : i32
    return %arg0, %arg1, %c0_i32, %c0_i32_0 : i32, i32, i32, i32
  }
  func.func @transform_1(%arg0: i32, %arg1: i32, %arg2: i32) -> (i32, i32, i32, i32) {
    %c0_i32 = arith.constant 0 : i32
    %c0_i32_0 = arith.constant 0 : i32
    return %arg0, %arg1, %c0_i32, %arg2 : i32, i32, i32, i32
  }
  func.func @transform_2(%arg0: i32, %arg1: i32, %arg2: i32) -> (i32, i32, i32, i32) {
    %c0_i32 = arith.constant 0 : i32
    %c0_i32_0 = arith.constant 0 : i32
    return %arg0, %arg1, %arg2, %c0_i32 : i32, i32, i32, i32
  }
  func.func @transform_3(%arg0: i32, %arg1: i32, %arg2: i32) -> (i32, i32, i32, i32) {
    %c0_i32 = arith.constant 0 : i32
    %c0_i32_0 = arith.constant 0 : i32
    %c0_i32_1 = arith.constant 0 : i32
    return %arg0, %arg1, %c0_i32, %c0_i32_0 : i32, i32, i32, i32
  }
}

module attributes {stable_mosaic.version = 11 : i64} {
  func.func @_matmul_kernel(%arg0: i32, %arg1: i32, %arg2: i32, %arg3: memref<16x32xbf16, #tpu.memory_space<vmem>>, %arg4: memref<32x60xbf16, #tpu.memory_space<vmem>>, %arg5: memref<1x60xf32, #tpu.memory_space<vmem>>, %arg6: memref<16x60xf32, #tpu.memory_space<vmem>>, %arg7: memref<16x60xf32, #tpu.memory_space<vmem>>) attributes {dimension_semantics = [#tpu.dimension_semantics<parallel>, #tpu.dimension_semantics<parallel>, #tpu.dimension_semantics<arbitrary>], iteration_bounds = array<i64: 1, 1, 1>, scalar_prefetch = 0 : i64, scratch_operands = 1 : i64, tpu.core_type = #tpu.core_type<tc>, window_params = [{transform_indices = @transform_0, window_bounds = array<i64: 16, 32>}, {transform_indices = @transform_1, window_bounds = array<i64: 32, 60>}, {transform_indices = @transform_2, window_bounds = array<i64: 1, 60>}, {transform_indices = @transform_3, window_bounds = array<i64: 16, 60>}]} {
    %c0_i32 = arith.constant 0 : i32
    %0 = arith.cmpi eq, %arg2, %c0_i32 : i32
    %1 = arith.extui %0 : i1 to i32
    %c0_i32_0 = arith.constant 0 : i32
    %2 = arith.cmpi ne, %1, %c0_i32_0 : i32
    scf.if %2 {
      %cst_10 = arith.constant 0.000000e+00 : f32
      %12 = vector.broadcast %cst_10 : f32 to vector<16x60xf32>
      %c0_11 = arith.constant 0 : index
      %c0_12 = arith.constant 0 : index
      %13 = vector.load %arg7[%c0_11, %c0_12] : memref<16x60xf32, #tpu.memory_space<vmem>>, vector<16x60xf32>
      tpu.vector_store %arg7[%c0_11, %c0_12], %12 {strides = array<i32>} : memref<16x60xf32, #tpu.memory_space<vmem>>, vector<16x60xf32>,
    } else {
    }
    %c0 = arith.constant 0 : index
    %c0_1 = arith.constant 0 : index
    %3 = vector.load %arg7[%c0, %c0_1] : memref<16x60xf32, #tpu.memory_space<vmem>>, vector<16x60xf32>
    %c0_2 = arith.constant 0 : index
    %c0_3 = arith.constant 0 : index
    %4 = vector.load %arg3[%c0_2, %c0_3] : memref<16x32xbf16, #tpu.memory_space<vmem>>, vector<16x32xbf16>
    %c0_4 = arith.constant 0 : index
    %c0_5 = arith.constant 0 : index
    %5 = vector.load %arg4[%c0_4, %c0_5] : memref<32x60xbf16, #tpu.memory_space<vmem>>, vector<32x60xbf16>
    %cst = arith.constant dense<0.000000e+00> : vector<16x60xf32>
    %6 = tpu.matmul %4, %5, %cst {dimension_numbers = #tpu.dot_dimension_numbers<[1], [0], [0], [1], [0, 0, 1, 1], [], []>} : vector<16x32xbf16>, vector<32x60xbf16>, vector<16x60xf32> -> vector<16x60xf32>
    %7 = arith.addf %3, %6 : vector<16x60xf32>
    %c0_6 = arith.constant 0 : index
    %c0_7 = arith.constant 0 : index
    %8 = vector.load %arg7[%c0_6, %c0_7] : memref<16x60xf32, #tpu.memory_space<vmem>>, vector<16x60xf32>
    tpu.vector_store %arg7[%c0_6, %c0_7], %7 {strides = array<i32>} : memref<16x60xf32, #tpu.memory_space<vmem>>, vector<16x60xf32>,
    %c0_i32_8 = arith.constant 0 : i32
    %9 = arith.cmpi eq, %arg2, %c0_i32_8 : i32
    %10 = arith.extui %9 : i1 to i32
    %c0_i32_9 = arith.constant 0 : i32
    %11 = arith.cmpi ne, %10, %c0_i32_9 : i32
    scf.if %11 {
      %c0_10 = arith.constant 0 : index
      %c0_11 = arith.constant 0 : index
      %12 = vector.load %arg7[%c0_10, %c0_11] : memref<16x60xf32, #tpu.memory_space<vmem>>, vector<16x60xf32>
      %c0_12 = arith.constant 0 : index
      %c0_13 = arith.constant 0 : index
      %13 = vector.load %arg5[%c0_12, %c0_13] : memref<1x60xf32, #tpu.memory_space<vmem>>, vector<1x60xf32>
      %14 = vector.broadcast %13 : vector<1x60xf32> to vector<16x60xf32>
      %15 = arith.addf %12, %14 : vector<16x60xf32>
      %c0_14 = arith.constant 0 : index
      %c0_15 = arith.constant 0 : index
      %16 = vector.load %arg6[%c0_14, %c0_15] : memref<16x60xf32, #tpu.memory_space<vmem>>, vector<16x60xf32>
      tpu.vector_store %arg6[%c0_14, %c0_15], %15 {strides = array<i32>} : memref<16x60xf32, #tpu.memory_space<vmem>>, vector<16x60xf32>,
    } else {
    }
    return
  }
  func.func @transform_0(%arg0: i32, %arg1: i32, %arg2: i32) -> (i32, i32) {
    %c0_i32 = arith.constant 0 : i32
    return %arg0, %arg2 : i32, i32
  }
  func.func @transform_1(%arg0: i32, %arg1: i32, %arg2: i32) -> (i32, i32) {
    %c0_i32 = arith.constant 0 : i32
    return %arg2, %arg1 : i32, i32
  }
  func.func @transform_2(%arg0: i32, %arg1: i32, %arg2: i32) -> (i32, i32) {
    %c0_i32 = arith.constant 0 : i32
    %c0_i32_0 = arith.constant 0 : i32
    return %c0_i32, %arg1 : i32, i32
  }
  func.func @transform_3(%arg0: i32, %arg1: i32, %arg2: i32) -> (i32, i32) {
    %c0_i32 = arith.constant 0 : i32
    return %arg0, %arg1 : i32, i32
  }
}

</mosaic_0001>

<bundles_post_ra>
// kernel: transformer_forward.36
= control target key start
LH: loop header
LB: loop body
LE: loop exit
PB: predicated region body
PF: predicated region fallthrough
CT: control target
= control target key end

     0   :  { %vm19_vm0 = vcmask 785408   ;;  %v151_v0 = vmov 0.0   ;;  %vm152_vm1 = vmmov 0   ;;  %vm47_vm2 = vcmask 261120   ;;  %s195_s1 = inlined_call_operand.vmem [shape: bf16[32,96], index: 1, kind: input, shape index: {}]   ;;  %s196_s0 = inlined_call_operand.vmem [shape: bf16[16,32], index: 0, kind: input, shape index: {}]   ;;  %s197_s2 = inlined_call_operand.vmem [shape: f32[1,96], index: 2, kind: input, shape index: {}]   ;;  %s198_s3 = inlined_call_operand.vmem [shape: bf16[16,96], index: 3, kind: output, shape index: {}]  }
   0x1   :  { %138 = vmatprep.subr.bf16.mxu0 %v151_v0  ;;  %v148_v1 = vld [vmem:[%s195_s1] sm:$0xff]   ;;  %142 = vmatprep.mubr.msk.bf16.mxu0 %vm152_vm1, %v151_v0  ;;  %20 = vst.msk [vmem:[#allocation2] sm:$0xff] %vm19_vm0, %v151_v0  ;;  %21 = vst.msk [vmem:[#allocation2 + $0x8] sm:$0xff] %vm19_vm0, %v151_v0  ;;  %v149_v2 = vld [vmem:[%s195_s1 + $0x8] sm:$0xff]   ;;  %vm119_vm3 = vcmask 781312  }
   0x2   :  { %139 = vmatpush3.bf16.msra.mxu0 %v148_v1  ;;  %v150_v3 = vld [vmem:[%s196_s0] sm:$0xff]  }
   0x3   :  { %140 = vmatprep.subr.bf16.mxu0 %v151_v0  ;;  %v130_v12 = vld [vmem:[%s197_s2] ss:$0 sm:$0xff] }
   0x6   :  { %141 = vmatpush3.bf16.msra.mxu0 %v149_v2 }
   0x8   :  { %v22_v4 = vld [vmem:[#allocation2] sm:$0xff]  ;;  %v23_v6 = vld [vmem:[#allocation2 + $0x8] sm:$0xff] }
   0x9   :  { %143 = vmatmul.mubr.msk.bf16.vlgmr.msra.gmra.mrb[0].mxu0 %vm47_vm2, %v150_v3 }
  0xdc   :  { %v85_v5 = vpop.f32.mrb[0].mxu0 }
  0xdd   :  { %v92_v7 = vadd.f32 %v85_v5, %v22_v4  ;;  %v144_v8 = vpop.f32.mrb[1].mxu0 }
  0xde   :  { %v88_v9 = vpop.f32.mrb[2].mxu0 }
  0xdf   :  { %95 = vst.msk [vmem:[#allocation2] sm:$0xff] %vm19_vm0, %v92_v7  ;;  %v93_v10 = vadd.f32 %v88_v9, %v23_v6  ;;  %v145_v11 = vpop.f32.mrb[3].mxu0 }
  0xe1   :  { %96 = vst.msk [vmem:[#allocation2 + $0x8] sm:$0xff] %vm19_vm0, %v93_v10 }
  0xe6   :  { %v100_v13 = vld [vmem:[#allocation2] sm:$0xff] }
  0xe7   :  { %v109_v14 = vadd.f32 %v130_v12, %v100_v13 }
  0xe8   :  { %v101_v15 = vld [vmem:[#allocation2 + $0x8] sm:$0xff] }
  0xe9   :  { %v133_v16 = vpack.c.bf16 %v109_v14, %v109_v14  ;;  %v110_v17 = vadd.f32 %v130_v12, %v101_v15 }
  0xeb   :  { %120 = vst.msk [vmem:[%s198_s3] sm:$0xf] %vm119_vm3, %v133_v16  ;;  %v134_v18 = vpack.c.bf16 %v110_v17, %v110_v17 }
  0xed   :  { %121 = vst.msk [vmem:[%s198_s3 + $0x4] sm:$0xf] %vm119_vm3, %v134_v18 }

// kernel: transformer_forward.37
= control target key start
LH: loop header
LB: loop body
LE: loop exit
PB: predicated region body
PF: predicated region fallthrough
CT: control target
= control target key end

     0   :  { %s740_s12 = smov 0   ;;  %s742_s13 = smov 0   ;;  %s815_s0 = inlined_call_operand.vmem [shape: bf16[2,4,8,8], index: 0, kind: input, shape index: {}]   ;;  %s816_s1 = inlined_call_operand.vmem [shape: bf16[2,4,8,8], index: 1, kind: input, shape index: {}]   ;;  %s817_s2 = inlined_call_operand.vmem [shape: bf16[2,4,8,8], index: 2, kind: input, shape index: {}]   ;;  %s818_s3 = inlined_call_operand.vmem [shape: bf16[2,4,8,8], index: 3, kind: output, shape index: {}]  }
   0x1   :  { %s744_s14 = smov 0   ;;  %s746_s15 = smov 0  }
   0x2   :  { %s748_s16 = smov 0  }
   0x3 LB: > { %s28_s17 = sadd.s32 1, %s706_s14  ;;  %s32_s18 = sadd.s32 1, %s710_s15  ;;  %s714_s16 = sphi %s748_s16, %s13_s16   ;;  %s710_s15 = sphi %s746_s15, %s822_s15   ;;  %s706_s14 = sphi %s744_s14, %s821_s14   ;;  %s702_s13 = sphi %s742_s13, %s820_s13   ;;  %s698_s12 = sphi %s740_s12, %s819_s12  }
   0x4   : > { %p30_p0 = scmp.ge.s32.totalorder %s28_s17, 4  ;;  %p595_p1 = scmp.ge.s32.totalorder %s714_s16, 1 }
   0x5   : > { %p203_p2 = scmp.lt.s32.totalorder %s714_s16, 9 }
   0x6   : > { %s824_s17 = smov (%p30_p0, %s28_s17), 0  ;;  %s826_s18 = smov (!%p30_p0, %s32_s18), %s710_s15 }
   0x7   : > { %p204_p3 = pnand %p595_p1, %p203_p2  ;;  %p34_p4 = scmp.ge.s32.totalorder %s826_s18, 2 }
   0x8   : > { %p255_p5 = scmp.lt.s32.totalorder (!%p204_p3), %s702_s13, 1  ;;  %p257_p6 = scmp.lt.s32.totalorder (!%p204_p3), %s698_s12, 3  ;;  %vm301_vm0 = vcmask (!%p204_p3), 64512   ;;  %v716_v0 = vmov (!%p204_p3), 0.0   ;;  %vm717_vm1 = vmmov (!%p204_p3), 0   ;;  %vm309_vm2 = vcmask (!%p204_p3), 1043456  }
   0x9   : > { %s828_s18 = smov (%p34_p4, %s826_s18), 0  ;;  %207 = sbr.rel (%p204_p3) target bundleno = 826 (0x33a), region = 32 }
   0xa   : > { %612 = vmatprep.subr.bf16.mxu0 (!%p204_p3), %v716_v0  ;;  %614 = vmatprep.mubr.msk.bf16.mxu0 (!%p204_p3), %vm717_vm1, %v716_v0  ;;  %302 = vst.msk [vmem:[#allocation4] sm:$0xff] (!%p204_p3), %vm301_vm0, %v716_v0  ;;  %vm298_vm3 = vcmask (!%p204_p3), 7168   ;;  %v718_v4 = vmov (!%p204_p3), -inf   ;;  %v354_v5 = vlaneseq (!%p204_p3)  ;;  %v719_v15 = vmov (!%p204_p3), 0  }
   0xb   : > { %618 = vmatprep.subr.bf16.mxu1 (!%p204_p3), %v716_v0  ;;  %620 = vmatprep.mubr.msk.bf16.mxu1 (!%p204_p3), %vm717_vm1, %v716_v0  ;;  %299 = vst.msk [vmem:[#allocation2] sm:$0xff] (!%p204_p3), %vm298_vm3, %v718_v4  ;;  %300 = vst.msk [vmem:[#allocation3] sm:$0xff] (!%p204_p3), %vm298_vm3, %v716_v0  ;;  %vm458_vm5 = vcmask (!%p204_p3), 60416  }
   0xc   : > { %v355_v6 = vshrl.u32 (!%p204_p3), %v354_v5, 7  ;;  %v357_v7 = vand.u32 (!%p204_p3), 127, %v354_v5  ;;  %668 = vset.pattern.permute.xlu0 (!%p204_p3), %v719_v15  ;;  %669 = vset.pattern.permute.xlu1 (!%p204_p3), %v719_v15 }
   0xe   : > { %vm361_vm4 = vcmp.gt.s32.totalorder (!%p204_p3), %v357_v7, %v355_v6 }
  0x10   : > { %s830_s13 = smov (!%p255_p5, %s702_s13), 1  ;;  %s832_s12 = smov (!%p257_p6, %s698_s12), 3 }
  0x11   : > { %s596_s19 = sshll.u32 %s830_s13, 2  ;;  %v387_v36 = vld [vmem:[#allocation4] sm:$0xff] }
  0x12   : > { %s260_s20 = sadd.s32 %s596_s19, %s832_s12  ;;  %v363_v16 = vld [vmem:[#allocation2] sm:$0xff]  ;;  %v379_v30 = vld [vmem:[#allocation3] sm:$0xff] }
  0x13   : > { %s771_s21 = sshll.u32 %s260_s20, 2 }
  0x14   : > { %s273_s24 = scalar_lea.vmem %s816_s1, %s771_s21  ;;  %s262_s27 = scalar_lea.vmem %s815_s0, %s771_s21 }
  0x15   : > { %v304_v1 = vld [vmem:[%s273_s24] sm:$0xf]  ;;  %s284_s30 = scalar_lea.vmem %s817_s2, %s771_s21  ;;  %s292_s6 = scalar_lea.vmem %s818_s3, %s771_s21 }
  0x16   : > { %v311_v2 = vsel %vm309_vm2, %v304_v1, 0  ;;  %v303_v3 = vld [vmem:[%s262_s27] sm:$0xf] }
  0x17   : > { %613 = vmatpush3.bf16.msra.mxu0 %v311_v2  ;;  %v395_v20 = vld [vmem:[%s284_s30] sm:$0xf] }
  0x18   : > { %v400_v21 = vsel %vm309_vm2, %v395_v20, 0 }
  0x19   : > { %619 = vmatpush3.bf16.msra.mxu1 %v400_v21 }
  0x1a   : > { %615 = vmatmul.mubr.msk.bf16.vlgmr.msra.gmra.mrb[0].mxu0 %vm301_vm0, %v303_v3 }
  0xed   : > { %v347_v8 = vpop.f32.mrb[0].mxu0 }
  0xee   : > { %v353_v9 = vmul.f32 0.35355338, %v347_v8  ;;  %v616_v10 = vpop.f32.mrb[1].mxu0 }
  0xef   : > { %v350_v11 = vpop.f32.mrb[2].mxu0 }
  0xf0   : > { %v617_v12 = vpop.f32.mrb[3].mxu0  ;;  %v362_v13 = vsel %vm361_vm4, -1e+09, %v353_v9 }
  0xf1   : > { %v364_v14 = vsel %vm301_vm0, %v362_v13, -inf }
  0xf2   : > { %365 = vmax.xlane.f32.xlu0 %v364_v14 }
 0x17f   : > { %v366_v17 = vpop.xlane.xlu0 %365 }
 0x180   : > { %v367_v18 = vmax.f32 %v363_v16, %v366_v17 }
 0x182   : > { %v368_v19 = vsub.f32 %v363_v16, %v367_v18  ;;  %444 = vst.msk [vmem:[#allocation2] sm:$0xff] %vm298_vm3, %v367_v18  ;;  %373 = vperm.xlu0 %668, %v367_v18  }
 0x184   : > { %v369_v28 = vmul.f32 1.442695, %v368_v19 }
 0x201   : > { %v374_v22 = vpop.permute.xlu0 %373 }
 0x202   : > { %v376_v23 = vsub.f32 %v362_v13, %v374_v22 }
 0x204   : > { %v377_v24 = vmul.f32 1.442695, %v376_v23 }
 0x206   : > { %670 = vpow2.f32 %v377_v24 }
 0x207   : > { %672 = vpow2.f32 %v369_v28 }
 0x210   : > { %v671_v25 = vpop.eup %670 }
 0x211   : > { %v381_v26 = vsel %vm301_vm0, %v671_v25, 0.0  ;;  %v394_v27 = vpack.c.bf16 %v671_v25, %v671_v25  ;;  %v673_v29 = vpop.eup %672 }
 0x212   : > { %382 = vadd.xlane.f32.xlu1 %v381_v26  ;;  %v380_v31 = vmul.f32 %v673_v29, %v379_v30 }
 0x213   : > { %621 = vmatmul.mubr.msk.bf16.vlgmr.msra.gmra.mrb[0].mxu1 %vm301_vm0, %v394_v27 }
 0x223   : > { %390 = vperm.xlu1 %669, %v673_v29  }
 0x29f   : > { %v383_v32 = vpop.xlane.xlu1 %382 }
 0x2a0   : > { %v384_v33 = vadd.f32 %v383_v32, %v380_v31 }
 0x2a2   : > { %386 = vst.msk [vmem:[#allocation3] sm:$0xff] %vm298_vm3, %v384_v33 }
 0x2a3   : > { %v391_v37 = vpop.permute.xlu1 %390 }
 0x2a4   : > { %v393_v38 = vmul.f32 %v391_v37, %v387_v36 }
 0x2a9   : > { %v449_v34 = vld [vmem:[#allocation3] sm:$0xff] }
 0x2aa   : > { %674 = vrcp.f32 %v449_v34 }
 0x2b4   : > { %v675_v35 = vpop.eup %674 }
 0x2b5   : > { %453 = vperm.xlu1 %669, %v675_v35  }
 0x2e6   : > { %v436_v39 = vpop.f32.mrb[0].mxu1 }
 0x2e7   : > { %v442_v40 = vadd.f32 %v436_v39, %v393_v38  ;;  %v622_v41 = vpop.f32.mrb[1].mxu1 }
 0x2e8   : > { %v439_v42 = vpop.f32.mrb[2].mxu1 }
 0x2e9   : > { %443 = vst.msk [vmem:[#allocation4] sm:$0xff] %vm301_vm0, %v442_v40  ;;  %v623_v43 = vpop.f32.mrb[3].mxu1 }
 0x2f0   : > { %v448_v44 = vld [vmem:[#allocation4] sm:$0xff] }
 0x334   : > { %v454_v45 = vpop.permute.xlu1 %453 }
 0x335   : > { %v456_v46 = vmul.f32 %v454_v45, %v448_v44 }
 0x337   : > { %v457_v47 = vpack.c.bf16 %v456_v46, %v456_v46 }
 0x339   : > { %459 = vst.msk [vmem:[%s292_s6] sm:$0xf] %vm458_vm5, %v457_v47 }
 0x33a PF: > { %s13_s16 = sadd.s32 1, %s714_s16   ;;  %s819_s12 = smov %s706_s14 }
 0x33b   : > { %p10_p7 = scmp.ge.s32.totalorder %s13_s16, 10   ;;  %s820_s13 = smov %s710_s15 }
 0x33c   : > { %s821_s14 = smov %s824_s17  ;;  %s822_s15 = smov %s828_s18 }
 0x33d   :  { %12 = sbr.rel (!%p10_p7) target bundleno = 3 (0x3), region = 76 }

// kernel: transformer_forward.38
= control target key start
LH: loop header
LB: loop body
LE: loop exit
PB: predicated region body
PF: predicated region fallthrough
CT: control target
= control target key end

     0   :  { %v200_v0 = vmov 0.0   ;;  %vm201_vm0 = vmmov 0   ;;  %vm54_vm1 = vcmask 261120   ;;  %vm158_vm2 = vcmask 257024   ;;  %s269_s1 = inlined_call_operand.vmem [shape: bf16[32,32], index: 1, kind: input, shape index: {}]   ;;  %s270_s0 = inlined_call_operand.vmem [shape: bf16[16,32], index: 0, kind: input, shape index: {}]   ;;  %s271_s3 = inlined_call_operand.vmem [shape: bf16[16,32], index: 3, kind: input, shape index: {}]   ;;  %s272_s2 = inlined_call_operand.vmem [shape: f32[1,32], index: 2, kind: input, shape index: {}]   ;;  %s273_s4 = inlined_call_operand.vmem [shape: f32[1,32], index: 4, kind: input, shape index: {}]   ;;  %s274_s5 = inlined_call_operand.vmem [shape: f32[1,32], index: 5, kind: input, shape index: {}]   ;;  %s275_s6 = inlined_call_operand.vmem [shape: bf16[16,32], index: 6, kind: output, shape index: {}]  }
   0x1   :  { %183 = vmatprep.subr.bf16.mxu0 %v200_v0  ;;  %v193_v1 = vld [vmem:[%s269_s1] sm:$0xff]   ;;  %187 = vmatprep.mubr.msk.bf16.mxu0 %vm201_vm0, %v200_v0  ;;  %v194_v2 = vld [vmem:[%s269_s1 + $0x8] sm:$0xff]  }
   0x2   :  { %184 = vmatpush3.bf16.msra.mxu0 %v193_v1  ;;  %v195_v3 = vld [vmem:[%s270_s0] sm:$0xff]  }
   0x3   :  { %185 = vmatprep.subr.bf16.mxu0 %v200_v0  ;;  %v177_v4 = vld [vmem:[%s271_s3] sm:$0xff]  }
   0x4   :  { %v165_v5 = vld [vmem:[%s272_s2] ss:$0 sm:$0xff]  ;;  %v178_v6 = vunpack.c.l.bf16 %v177_v4  ;;  %v179_v10 = vunpack.c.h.bf16 %v177_v4 }
   0x5   :  { %v170_v35 = vld [vmem:[%s273_s4] ss:$0 sm:$0xff] }
   0x6   :  { %186 = vmatpush3.bf16.msra.mxu0 %v194_v2  ;;  %v171_v37 = vld [vmem:[%s274_s5] ss:$0 sm:$0xff] }
   0x9   :  { %188 = vmatmul.mubr.msk.bf16.vlgmr.msra.gmra.mrb[0].mxu0 %vm54_vm1, %v195_v3 }
  0xdc   :  { %v92_v7 = vpop.f32.mrb[0].mxu0 }
  0xdd   :  { %v93_v8 = vadd.f32 %v165_v5, %v92_v7  ;;  %v189_v9 = vpop.f32.mrb[1].mxu0 }
  0xde   :  { %v95_v11 = vpop.f32.mrb[2].mxu0 }
  0xdf   :  { %v96_v12 = vadd.f32 %v165_v5, %v95_v11  ;;  %v190_v13 = vpop.f32.mrb[3].mxu0  ;;  %v103_v14 = vadd.f32 %v178_v6, %v93_v8 }
  0xe1   :  { %v105_v15 = vsel %vm54_vm1, %v103_v14, 0.0  ;;  %v104_v16 = vadd.f32 %v179_v10, %v96_v12 }
  0xe2   :  { %106 = vadd.xlane.f32.xlu0 %v105_v15 }
  0xe3   :  { %v108_v17 = vsel %vm54_vm1, %v104_v16, 0.0 }
  0xe6   :  { %109 = vadd.xlane.f32.xlu0 %v108_v17 }
 0x16f   :  { %v107_v18 = vpop.xlane.xlu0 %106 }
 0x170   :  { %v112_v19 = vmul.f32 0.03125, %v107_v18 }
 0x172   :  { %v114_v20 = vsub.f32 %v103_v14, %v112_v19 }
 0x173   :  { %v110_v21 = vpop.xlane.xlu0 %109 }
 0x174   :  { %v113_v22 = vmul.f32 0.03125, %v110_v21  ;;  %v116_v23 = vmul.f32 %v114_v20, %v114_v20 }
 0x176   :  { %v115_v24 = vsub.f32 %v104_v16, %v113_v22  ;;  %v118_v25 = vsel %vm54_vm1, %v116_v23, 0.0 }
 0x177   :  { %119 = vadd.xlane.f32.xlu1 %v118_v25 }
 0x178   :  { %v117_v26 = vmul.f32 %v115_v24, %v115_v24 }
 0x17a   :  { %v121_v27 = vsel %vm54_vm1, %v117_v26, 0.0 }
 0x17b   :  { %122 = vadd.xlane.f32.xlu1 %v121_v27 }
 0x204   :  { %v120_v28 = vpop.xlane.xlu1 %119 }
 0x205   :  { %v124_v29 = vmul.f32 0.03125, %v120_v28 }
 0x207   :  { %v126_v30 = vadd.f32 1e-05, %v124_v29 }
 0x208   :  { %v123_v31 = vpop.xlane.xlu1 %122 }
 0x209   :  { %196 = vrsqrt.f32 %v126_v30  ;;  %v125_v32 = vmul.f32 0.03125, %v123_v31 }
 0x20b   :  { %v127_v33 = vadd.f32 1e-05, %v125_v32 }
 0x20d   :  { %198 = vrsqrt.f32 %v127_v33 }
 0x213   :  { %v197_v34 = vpop.eup %196 }
 0x214   :  { %v130_v36 = vmul.f32 %v197_v34, %v114_v20 }
 0x216   :  { %v139_v38 = vmul.f32 %v170_v35, %v130_v36 }
 0x217   :  { %v199_v39 = vpop.eup %198 }
 0x218   :  { %v148_v40 = vadd.f32 %v171_v37, %v139_v38  ;;  %v131_v41 = vmul.f32 %v199_v39, %v115_v24 }
 0x21a   :  { %v174_v42 = vpack.c.bf16 %v148_v40, %v148_v40  ;;  %v140_v43 = vmul.f32 %v170_v35, %v131_v41 }
 0x21c   :  { %159 = vst.msk [vmem:[%s275_s6] sm:$0xf] %vm158_vm2, %v174_v42  ;;  %v149_v44 = vadd.f32 %v171_v37, %v140_v43 }
 0x21e   :  { %v175_v45 = vpack.c.bf16 %v149_v44, %v149_v44 }
 0x220   :  { %160 = vst.msk [vmem:[%s275_s6 + $0x4] sm:$0xf] %vm158_vm2, %v175_v45 }

// kernel: transformer_forward.39
= control target key start
LH: loop header
LB: loop body
LE: loop exit
PB: predicated region body
PF: predicated region fallthrough
CT: control target
= control target key end

     0   :  { %vm19_vm0 = vcmask 261120   ;;  %v150_v0 = vmov 0.0   ;;  %vm151_vm1 = vmmov 0   ;;  %vm118_vm2 = vcmask 257024   ;;  %s195_s1 = inlined_call_operand.vmem [shape: bf16[32,32], index: 1, kind: input, shape index: {}]   ;;  %s196_s0 = inlined_call_operand.vmem [shape: bf16[16,32], index: 0, kind: input, shape index: {}]   ;;  %s197_s2 = inlined_call_operand.vmem [shape: f32[1,32], index: 2, kind: input, shape index: {}]   ;;  %s198_s3 = inlined_call_operand.vmem [shape: bf16[16,32], index: 3, kind: output, shape index: {}]  }
   0x1   :  { %137 = vmatprep.subr.bf16.mxu0 %v150_v0  ;;  %v147_v1 = vld [vmem:[%s195_s1] sm:$0xff]   ;;  %141 = vmatprep.mubr.msk.bf16.mxu0 %vm151_vm1, %v150_v0  ;;  %20 = vst.msk [vmem:[#allocation2] sm:$0xff] %vm19_vm0, %v150_v0  ;;  %21 = vst.msk [vmem:[#allocation2 + $0x8] sm:$0xff] %vm19_vm0, %v150_v0  ;;  %v148_v2 = vld [vmem:[%s195_s1 + $0x8] sm:$0xff]  }
   0x2   :  { %138 = vmatpush3.bf16.msra.mxu0 %v147_v1  ;;  %v149_v3 = vld [vmem:[%s196_s0] sm:$0xff]  }
   0x3   :  { %139 = vmatprep.subr.bf16.mxu0 %v150_v0  ;;  %v129_v12 = vld [vmem:[%s197_s2] ss:$0 sm:$0xff] }
   0x6   :  { %140 = vmatpush3.bf16.msra.mxu0 %v148_v2 }
   0x8   :  { %v22_v4 = vld [vmem:[#allocation2] sm:$0xff]  ;;  %v23_v6 = vld [vmem:[#allocation2 + $0x8] sm:$0xff] }
   0x9   :  { %142 = vmatmul.mubr.msk.bf16.vlgmr.msra.gmra.mrb[0].mxu0 %vm19_vm0, %v149_v3 }
  0xdc   :  { %v85_v5 = vpop.f32.mrb[0].mxu0 }
  0xdd   :  { %v92_v7 = vadd.f32 %v85_v5, %v22_v4  ;;  %v143_v8 = vpop.f32.mrb[1].mxu0 }
  0xde   :  { %v88_v9 = vpop.f32.mrb[2].mxu0 }
  0xdf   :  { %94 = vst.msk [vmem:[#allocation2] sm:$0xff] %vm19_vm0, %v92_v7  ;;  %v93_v10 = vadd.f32 %v88_v9, %v23_v6  ;;  %v144_v11 = vpop.f32.mrb[3].mxu0 }
  0xe1   :  { %95 = vst.msk [vmem:[#allocation2 + $0x8] sm:$0xff] %vm19_vm0, %v93_v10 }
  0xe6   :  { %v99_v13 = vld [vmem:[#allocation2] sm:$0xff] }
  0xe7   :  { %v108_v14 = vadd.f32 %v129_v12, %v99_v13 }
  0xe8   :  { %v100_v15 = vld [vmem:[#allocation2 + $0x8] sm:$0xff] }
  0xe9   :  { %v132_v16 = vpack.c.bf16 %v108_v14, %v108_v14  ;;  %v109_v17 = vadd.f32 %v129_v12, %v100_v15 }
  0xeb   :  { %119 = vst.msk [vmem:[%s198_s3] sm:$0xf] %vm118_vm2, %v132_v16  ;;  %v133_v18 = vpack.c.bf16 %v109_v17, %v109_v17 }
  0xed   :  { %120 = vst.msk [vmem:[%s198_s3 + $0x4] sm:$0xf] %vm118_vm2, %v133_v18 }

// kernel: transformer_forward.35
= control target key start
LH: loop header
LB: loop body
LE: loop exit
PB: predicated region body
PF: predicated region fallthrough
CT: control target
= control target key end

     0   :  { %vm18_vm0 = vcmask 261120   ;;  %vm72_vm1 = vcmask 257024   ;;  %s132_s0 = inlined_call_operand.vmem [shape: bf16[16,32], index: 0, kind: input, shape index: {}]   ;;  %s133_s1 = inlined_call_operand.vmem [shape: f32[1,32], index: 1, kind: input, shape index: {}]   ;;  %s134_s2 = inlined_call_operand.vmem [shape: f32[1,32], index: 2, kind: input, shape index: {}]   ;;  %s135_s3 = inlined_call_operand.vmem [shape: bf16[16,32], index: 3, kind: output, shape index: {}]  }
   0x1   :  { %v86_v0 = vld [vmem:[%s132_s0] sm:$0xff]  }
   0x2   :  { %v87_v1 = vunpack.c.l.bf16 %v86_v0  ;;  %v88_v2 = vunpack.c.h.bf16 %v86_v0  ;;  %v79_v22 = vld [vmem:[%s133_s1] ss:$0 sm:$0xff] }
   0x3   :  { %v80_v24 = vld [vmem:[%s134_s2] ss:$0 sm:$0xff] }
   0x4   :  { %v19_v3 = vsel %vm18_vm0, %v87_v1, 0.0  ;;  %v22_v4 = vsel %vm18_vm0, %v88_v2, 0.0 }
   0x5   :  { %20 = vadd.xlane.f32.xlu0 %v19_v3 }
   0x9   :  { %23 = vadd.xlane.f32.xlu0 %v22_v4 }
  0x92   :  { %v21_v5 = vpop.xlane.xlu0 %20 }
  0x93   :  { %v26_v6 = vmul.f32 0.03125, %v21_v5 }
  0x95   :  { %v28_v7 = vsub.f32 %v87_v1, %v26_v6 }
  0x96   :  { %v24_v8 = vpop.xlane.xlu0 %23 }
  0x97   :  { %v27_v9 = vmul.f32 0.03125, %v24_v8  ;;  %v30_v10 = vmul.f32 %v28_v7, %v28_v7 }
  0x99   :  { %v29_v11 = vsub.f32 %v88_v2, %v27_v9  ;;  %v32_v12 = vsel %vm18_vm0, %v30_v10, 0.0 }
  0x9a   :  { %33 = vadd.xlane.f32.xlu1 %v32_v12 }
  0x9b   :  { %v31_v13 = vmul.f32 %v29_v11, %v29_v11 }
  0x9d   :  { %v35_v14 = vsel %vm18_vm0, %v31_v13, 0.0 }
  0x9e   :  { %36 = vadd.xlane.f32.xlu1 %v35_v14 }
 0x127   :  { %v34_v15 = vpop.xlane.xlu1 %33 }
 0x128   :  { %v38_v16 = vmul.f32 0.03125, %v34_v15 }
 0x12a   :  { %v40_v17 = vadd.f32 1e-05, %v38_v16 }
 0x12b   :  { %v37_v18 = vpop.xlane.xlu1 %36 }
 0x12c   :  { %89 = vrsqrt.f32 %v40_v17  ;;  %v39_v19 = vmul.f32 0.03125, %v37_v18 }
 0x12e   :  { %v41_v20 = vadd.f32 1e-05, %v39_v19 }
 0x130   :  { %91 = vrsqrt.f32 %v41_v20 }
 0x136   :  { %v90_v21 = vpop.eup %89 }
 0x137   :  { %v44_v23 = vmul.f32 %v90_v21, %v28_v7 }
 0x139   :  { %v53_v25 = vmul.f32 %v79_v22, %v44_v23 }
 0x13a   :  { %v92_v26 = vpop.eup %91 }
 0x13b   :  { %v62_v27 = vadd.f32 %v80_v24, %v53_v25  ;;  %v45_v28 = vmul.f32 %v92_v26, %v29_v11 }
 0x13d   :  { %v83_v29 = vpack.c.bf16 %v62_v27, %v62_v27  ;;  %v54_v30 = vmul.f32 %v79_v22, %v45_v28 }
 0x13f   :  { %73 = vst.msk [vmem:[%s135_s3] sm:$0xf] %vm72_vm1, %v83_v29  ;;  %v63_v31 = vadd.f32 %v80_v24, %v54_v30 }
 0x141   :  { %v84_v32 = vpack.c.bf16 %v63_v31, %v63_v31 }
 0x143   :  { %74 = vst.msk [vmem:[%s135_s3 + $0x4] sm:$0xf] %vm72_vm1, %v84_v32 }

// kernel: transformer_forward.28
= control target key start
LH: loop header
LB: loop body
LE: loop exit
PB: predicated region body
PF: predicated region fallthrough
CT: control target
= control target key end

     0   :  { %s809_s15 = smov 0   ;;  %s811_s16 = smov 0   ;;  %s887_s0 = inlined_call_operand.vmem [shape: bf16[2,4,8,8], index: 0, kind: input, shape index: {}]   ;;  %s888_s1 = inlined_call_operand.vmem [shape: bf16[2,4,8,8], index: 1, kind: input, shape index: {}]   ;;  %s889_s2 = inlined_call_operand.vmem [shape: bf16[2,4,8,8], index: 2, kind: input, shape index: {}]   ;;  %s890_s3 = inlined_call_operand.vmem [shape: f32[2,1,8], index: 3, kind: input, shape index: {}]   ;;  %s891_s4 = inlined_call_operand.vmem [shape: bf16[2,4,8,8], index: 4, kind: output, shape index: {}]  }
   0x1   :  { %s813_s17 = smov 0   ;;  %s815_s18 = smov 0  }
   0x2   :  { %s817_s19 = smov 0  }
   0x3 LB: > { %s29_s20 = sadd.s32 1, %s770_s17  ;;  %s33_s21 = sadd.s32 1, %s774_s18  ;;  %s778_s19 = sphi %s817_s19, %s14_s19   ;;  %s774_s18 = sphi %s815_s18, %s895_s18   ;;  %s770_s17 = sphi %s813_s17, %s894_s17   ;;  %s766_s16 = sphi %s811_s16, %s893_s16   ;;  %s762_s15 = sphi %s809_s15, %s892_s15  }
   0x4   : > { %p31_p0 = scmp.ge.s32.totalorder %s29_s20, 4  ;;  %p658_p1 = scmp.ge.s32.totalorder %s778_s19, 1 }
   0x5   : > { %p241_p2 = scmp.lt.s32.totalorder %s778_s19, 9 }
   0x6   : > { %s897_s20 = smov (%p31_p0, %s29_s20), 0  ;;  %s899_s21 = smov (!%p31_p0, %s33_s21), %s774_s18 }
   0x7   : > { %p242_p3 = pnand %p658_p1, %p241_p2  ;;  %p35_p4 = scmp.ge.s32.totalorder %s899_s21, 2 }
   0x8   : > { %p301_p5 = scmp.lt.s32.totalorder (!%p242_p3), %s766_s16, 1  ;;  %p303_p6 = scmp.lt.s32.totalorder (!%p242_p3), %s762_s15, 3  ;;  %vm353_vm0 = vcmask (!%p242_p3), 64512   ;;  %v780_v0 = vmov (!%p242_p3), 0.0   ;;  %vm781_vm1 = vmmov (!%p242_p3), 0   ;;  %vm361_vm2 = vcmask (!%p242_p3), 1043456  }
   0x9   : > { %s901_s21 = smov (%p35_p4, %s899_s21), 0  ;;  %245 = sbr.rel (%p242_p3) target bundleno = 827 (0x33b), region = 36 }
   0xa   : > { %676 = vmatprep.subr.bf16.mxu0 (!%p242_p3), %v780_v0  ;;  %678 = vmatprep.mubr.msk.bf16.mxu0 (!%p242_p3), %vm781_vm1, %v780_v0  ;;  %354 = vst.msk [vmem:[#allocation4] sm:$0xff] (!%p242_p3), %vm353_vm0, %v780_v0  ;;  %vm350_vm3 = vcmask (!%p242_p3), 7168   ;;  %v782_v4 = vmov (!%p242_p3), -inf   ;;  %v783_v13 = vmov (!%p242_p3), 0   ;;  %vm509_vm4 = vcmask (!%p242_p3), 60416  }
   0xb   : > { %682 = vmatprep.subr.bf16.mxu1 (!%p242_p3), %v780_v0  ;;  %684 = vmatprep.mubr.msk.bf16.mxu1 (!%p242_p3), %vm781_vm1, %v780_v0  ;;  %351 = vst.msk [vmem:[#allocation2] sm:$0xff] (!%p242_p3), %vm350_vm3, %v782_v4  ;;  %352 = vst.msk [vmem:[#allocation3] sm:$0xff] (!%p242_p3), %vm350_vm3, %v780_v0 }
   0xc   : > { %732 = vset.pattern.permute.xlu0 (!%p242_p3), %v783_v13  ;;  %733 = vset.pattern.permute.xlu1 (!%p242_p3), %v783_v13 }
  0x10   : > { %s903_s16 = smov (!%p301_p5, %s766_s16), 1  ;;  %s905_s15 = smov (!%p303_p6, %s762_s15), 3 }
  0x11   : > { %s659_s22 = sshll.u32 %s903_s16, 2  ;;  %s336_s7 = scalar_lea.vmem %s890_s3, %s903_s16  ;;  %v438_v34 = vld [vmem:[#allocation4] sm:$0xff] }
  0x12   : > { %s306_s23 = sadd.s32 %s659_s22, %s905_s15  ;;  %v668_v6 = vld [vmem:[%s336_s7] ss:$0 sm:$0xff]  ;;  %v430_v28 = vld [vmem:[#allocation3] sm:$0xff] }
  0x13   : > { %s840_s24 = sshll.u32 %s306_s23, 2  ;;  %v414_v14 = vld [vmem:[#allocation2] sm:$0xff] }
  0x14   : > { %s319_s27 = scalar_lea.vmem %s888_s1, %s840_s24  ;;  %s308_s30 = scalar_lea.vmem %s887_s0, %s840_s24 }
  0x15   : > { %v356_v1 = vld [vmem:[%s319_s27] sm:$0xf]  ;;  %s330_s10 = scalar_lea.vmem %s889_s2, %s840_s24  ;;  %s344_s13 = scalar_lea.vmem %s891_s4, %s840_s24 }
  0x16   : > { %v363_v2 = vsel %vm361_vm2, %v356_v1, 0  ;;  %v355_v3 = vld [vmem:[%s308_s30] sm:$0xf] }
  0x17   : > { %677 = vmatpush3.bf16.msra.mxu0 %v363_v2  ;;  %v446_v18 = vld [vmem:[%s330_s10] sm:$0xf] }
  0x18   : > { %v451_v19 = vsel %vm361_vm2, %v446_v18, 0 }
  0x19   : > { %683 = vmatpush3.bf16.msra.mxu1 %v451_v19 }
  0x1a   : > { %679 = vmatmul.mubr.msk.bf16.vlgmr.msra.gmra.mrb[0].mxu0 %vm353_vm0, %v355_v3 }
  0xed   : > { %v399_v5 = vpop.f32.mrb[0].mxu0 }
  0xee   : > { %v405_v7 = vmul.f32 0.35355338, %v399_v5  ;;  %v680_v8 = vpop.f32.mrb[1].mxu0 }
  0xef   : > { %v402_v9 = vpop.f32.mrb[2].mxu0 }
  0xf0   : > { %v681_v10 = vpop.f32.mrb[3].mxu0  ;;  %v413_v11 = vadd.f32 %v668_v6, %v405_v7 }
  0xf2   : > { %v415_v12 = vsel %vm353_vm0, %v413_v11, -inf }
  0xf3   : > { %416 = vmax.xlane.f32.xlu0 %v415_v12 }
 0x180   : > { %v417_v15 = vpop.xlane.xlu0 %416 }
 0x181   : > { %v418_v16 = vmax.f32 %v414_v14, %v417_v15 }
 0x183   : > { %v419_v17 = vsub.f32 %v414_v14, %v418_v16  ;;  %495 = vst.msk [vmem:[#allocation2] sm:$0xff] %vm350_vm3, %v418_v16  ;;  %424 = vperm.xlu0 %732, %v418_v16  }
 0x185   : > { %v420_v26 = vmul.f32 1.442695, %v419_v17 }
 0x202   : > { %v425_v20 = vpop.permute.xlu0 %424 }
 0x203   : > { %v427_v21 = vsub.f32 %v413_v11, %v425_v20 }
 0x205   : > { %v428_v22 = vmul.f32 1.442695, %v427_v21 }
 0x207   : > { %734 = vpow2.f32 %v428_v22 }
 0x208   : > { %736 = vpow2.f32 %v420_v26 }
 0x211   : > { %v735_v23 = vpop.eup %734 }
 0x212   : > { %v432_v24 = vsel %vm353_vm0, %v735_v23, 0.0  ;;  %v445_v25 = vpack.c.bf16 %v735_v23, %v735_v23  ;;  %v737_v27 = vpop.eup %736 }
 0x213   : > { %433 = vadd.xlane.f32.xlu1 %v432_v24  ;;  %v431_v29 = vmul.f32 %v737_v27, %v430_v28 }
 0x214   : > { %685 = vmatmul.mubr.msk.bf16.vlgmr.msra.gmra.mrb[0].mxu1 %vm353_vm0, %v445_v25 }
 0x224   : > { %441 = vperm.xlu1 %733, %v737_v27  }
 0x2a0   : > { %v434_v30 = vpop.xlane.xlu1 %433 }
 0x2a1   : > { %v435_v31 = vadd.f32 %v434_v30, %v431_v29 }
 0x2a3   : > { %437 = vst.msk [vmem:[#allocation3] sm:$0xff] %vm350_vm3, %v435_v31 }
 0x2a4   : > { %v442_v35 = vpop.permute.xlu1 %441 }
 0x2a5   : > { %v444_v36 = vmul.f32 %v442_v35, %v438_v34 }
 0x2aa   : > { %v500_v32 = vld [vmem:[#allocation3] sm:$0xff] }
 0x2ab   : > { %738 = vrcp.f32 %v500_v32 }
 0x2b5   : > { %v739_v33 = vpop.eup %738 }
 0x2b6   : > { %504 = vperm.xlu1 %733, %v739_v33  }
 0x2e7   : > { %v487_v37 = vpop.f32.mrb[0].mxu1 }
 0x2e8   : > { %v493_v38 = vadd.f32 %v487_v37, %v444_v36  ;;  %v686_v39 = vpop.f32.mrb[1].mxu1 }
 0x2e9   : > { %v490_v40 = vpop.f32.mrb[2].mxu1 }
 0x2ea   : > { %494 = vst.msk [vmem:[#allocation4] sm:$0xff] %vm353_vm0, %v493_v38  ;;  %v687_v41 = vpop.f32.mrb[3].mxu1 }
 0x2f1   : > { %v499_v42 = vld [vmem:[#allocation4] sm:$0xff] }
 0x335   : > { %v505_v43 = vpop.permute.xlu1 %504 }
 0x336   : > { %v507_v44 = vmul.f32 %v505_v43, %v499_v42 }
 0x338   : > { %v508_v45 = vpack.c.bf16 %v507_v44, %v507_v44 }
 0x33a   : > { %510 = vst.msk [vmem:[%s344_s13] sm:$0xf] %vm509_vm4, %v508_v45 }
 0x33b PF: > { %s14_s19 = sadd.s32 1, %s778_s19   ;;  %s892_s15 = smov %s770_s17 }
 0x33c   : > { %p11_p7 = scmp.ge.s32.totalorder %s14_s19, 10   ;;  %s893_s16 = smov %s774_s18 }
 0x33d   : > { %s894_s17 = smov %s897_s20  ;;  %s895_s18 = smov %s901_s21 }
 0x33e   :  { %13 = sbr.rel (!%p11_p7) target bundleno = 3 (0x3), region = 83 }

// kernel: transformer_forward.40
= control target key start
LH: loop header
LB: loop body
LE: loop exit
PB: predicated region body
PF: predicated region fallthrough
CT: control target
= control target key end

     0   :  { %vm19_vm0 = vcmask 523264   ;;  %v151_v0 = vmov 0.0   ;;  %vm152_vm1 = vmmov 0   ;;  %vm47_vm2 = vcmask 261120   ;;  %s195_s1 = inlined_call_operand.vmem [shape: bf16[32,64], index: 1, kind: input, shape index: {}]   ;;  %s196_s0 = inlined_call_operand.vmem [shape: bf16[16,32], index: 0, kind: input, shape index: {}]   ;;  %s197_s2 = inlined_call_operand.vmem [shape: f32[1,64], index: 2, kind: input, shape index: {}]   ;;  %s198_s3 = inlined_call_operand.vmem [shape: bf16[16,64], index: 3, kind: output, shape index: {}]  }
   0x1   :  { %138 = vmatprep.subr.bf16.mxu0 %v151_v0  ;;  %v148_v1 = vld [vmem:[%s195_s1] sm:$0xff]   ;;  %142 = vmatprep.mubr.msk.bf16.mxu0 %vm152_vm1, %v151_v0  ;;  %20 = vst.msk [vmem:[#allocation2] sm:$0xff] %vm19_vm0, %v151_v0  ;;  %21 = vst.msk [vmem:[#allocation2 + $0x8] sm:$0xff] %vm19_vm0, %v151_v0  ;;  %v149_v2 = vld [vmem:[%s195_s1 + $0x8] sm:$0xff]   ;;  %vm119_vm3 = vcmask 519168  }
   0x2   :  { %139 = vmatpush3.bf16.msra.mxu0 %v148_v1  ;;  %v150_v3 = vld [vmem:[%s196_s0] sm:$0xff]  }
   0x3   :  { %140 = vmatprep.subr.bf16.mxu0 %v151_v0  ;;  %v130_v12 = vld [vmem:[%s197_s2] ss:$0 sm:$0xff] }
   0x6   :  { %141 = vmatpush3.bf16.msra.mxu0 %v149_v2 }
   0x8   :  { %v22_v4 = vld [vmem:[#allocation2] sm:$0xff]  ;;  %v23_v6 = vld [vmem:[#allocation2 + $0x8] sm:$0xff] }
   0x9   :  { %143 = vmatmul.mubr.msk.bf16.vlgmr.msra.gmra.mrb[0].mxu0 %vm47_vm2, %v150_v3 }
  0xdc   :  { %v85_v5 = vpop.f32.mrb[0].mxu0 }
  0xdd   :  { %v92_v7 = vadd.f32 %v85_v5, %v22_v4  ;;  %v144_v8 = vpop.f32.mrb[1].mxu0 }
  0xde   :  { %v88_v9 = vpop.f32.mrb[2].mxu0 }
  0xdf   :  { %95 = vst.msk [vmem:[#allocation2] sm:$0xff] %vm19_vm0, %v92_v7  ;;  %v93_v10 = vadd.f32 %v88_v9, %v23_v6  ;;  %v145_v11 = vpop.f32.mrb[3].mxu0 }
  0xe1   :  { %96 = vst.msk [vmem:[#allocation2 + $0x8] sm:$0xff] %vm19_vm0, %v93_v10 }
  0xe6   :  { %v100_v13 = vld [vmem:[#allocation2] sm:$0xff] }
  0xe7   :  { %v109_v14 = vadd.f32 %v130_v12, %v100_v13 }
  0xe8   :  { %v101_v15 = vld [vmem:[#allocation2 + $0x8] sm:$0xff] }
  0xe9   :  { %v133_v16 = vpack.c.bf16 %v109_v14, %v109_v14  ;;  %v110_v17 = vadd.f32 %v130_v12, %v101_v15 }
  0xeb   :  { %120 = vst.msk [vmem:[%s198_s3] sm:$0xf] %vm119_vm3, %v133_v16  ;;  %v134_v18 = vpack.c.bf16 %v110_v17, %v110_v17 }
  0xed   :  { %121 = vst.msk [vmem:[%s198_s3 + $0x4] sm:$0xf] %vm119_vm3, %v134_v18 }

// kernel: transformer_forward.30
= control target key start
LH: loop header
LB: loop body
LE: loop exit
PB: predicated region body
PF: predicated region fallthrough
CT: control target
= control target key end

     0   :  { %v312_v0 = vmov 0.0   ;;  %vm313_vm0 = vmmov 0   ;;  %vm57_vm1 = vcmask 261120   ;;  %vm144_vm2 = vcmask 523264   ;;  %s398_s1 = inlined_call_operand.vmem [shape: bf16[32,64], index: 1, kind: input, shape index: {}]   ;;  %s399_s0 = inlined_call_operand.vmem [shape: bf16[16,32], index: 0, kind: input, shape index: {}]   ;;  %s400_s3 = inlined_call_operand.vmem [shape: bf16[64,32], index: 3, kind: input, shape index: {}]   ;;  %s401_s2 = inlined_call_operand.vmem [shape: f32[1,64], index: 2, kind: input, shape index: {}]   ;;  %s402_s4 = inlined_call_operand.vmem [shape: f32[1,32], index: 4, kind: input, shape index: {}]   ;;  %s403_s5 = inlined_call_operand.vmem [shape: f32[1,32], index: 5, kind: input, shape index: {}]   ;;  %s404_s6 = inlined_call_operand.vmem [shape: f32[1,32], index: 6, kind: input, shape index: {}]   ;;  %s405_s7 = inlined_call_operand.vmem [shape: bf16[16,32], index: 7, kind: output, shape index: {}]  }
   0x1   :  { %278 = vmatprep.subr.bf16.mxu0 %v312_v0  ;;  %v300_v1 = vld [vmem:[%s398_s1] sm:$0xff]   ;;  %282 = vmatprep.mubr.msk.bf16.mxu0 %vm313_vm0, %v312_v0  ;;  %v301_v2 = vld [vmem:[%s398_s1 + $0x8] sm:$0xff]   ;;  %v305_v6 = vld [vmem:[%s400_s3 + $0x10] sm:$0xff]   ;;  %vm246_vm3 = vcmask 257024  }
   0x2   :  { %286 = vmatprep.subr.bf16.mxu1 %v312_v0  ;;  %294 = vmatprep.mubr.msk.bf16.mxu1 %vm313_vm0, %v312_v0  ;;  %v27_v3 = vld [vmem:[%s399_s0] sm:$0xff]   ;;  %v304_v5 = vld [vmem:[%s400_s3 + $0x8] sm:$0xff]   ;;  %v306_v7 = vld [vmem:[%s400_s3 + $0x18] sm:$0xff]  }
   0x3   :  { %279 = vmatpush3.bf16.msra.mxu0 %v300_v1  ;;  %v303_v4 = vld [vmem:[%s400_s3] sm:$0xff]   ;;  %v189_v19 = vunpack.c.l.bf16 %v27_v3  ;;  %v190_v23 = vunpack.c.h.bf16 %v27_v3 }
   0x4   :  { %280 = vmatprep.subr.bf16.mxu0 %v312_v0  ;;  %287 = vmatpush3.bf16.msra.mxu1 %v303_v4  ;;  %v253_v8 = vld [vmem:[%s401_s2] ss:$0 sm:$0xff] }
   0x5   :  { %288 = vmatprep.subr.bf16.mxu1 %v312_v0  ;;  %v258_v18 = vld [vmem:[%s402_s4] ss:$0 sm:$0xff] }
   0x6   :  { %v264_v48 = vld [vmem:[%s403_s5] ss:$0 sm:$0xff] }
   0x7   :  { %281 = vmatpush3.bf16.msra.mxu0 %v301_v2  ;;  %v265_v50 = vld [vmem:[%s404_s6] ss:$0 sm:$0xff] }
   0x8   :  { %289 = vmatpush3.bf16.msra.mxu1 %v304_v5 }
   0x9   :  { %290 = vmatprep.subr.bf16.mxu1 %v312_v0 }
   0xa   :  { %283 = vmatmul.mubr.msk.bf16.vlgmr.msra.gmra.mrb[0].mxu0 %vm57_vm1, %v27_v3 }
   0xc   :  { %291 = vmatpush3.bf16.msra.mxu1 %v305_v6 }
   0xd   :  { %292 = vmatprep.subr.bf16.mxu1 %v312_v0 }
  0x10   :  { %293 = vmatpush3.bf16.msra.mxu1 %v306_v7 }
  0xdd   :  { %v95_v9 = vpop.f32.mrb[0].mxu0 }
  0xde   :  { %v96_v10 = vadd.f32 %v253_v8, %v95_v9  ;;  %v284_v11 = vpop.f32.mrb[1].mxu0 }
  0xdf   :  { %v98_v12 = vpop.f32.mrb[2].mxu0 }
  0xe0   :  { %v99_v13 = vadd.f32 %v253_v8, %v98_v12  ;;  %v285_v14 = vpop.f32.mrb[3].mxu0  ;;  %v102_v15 = vmax.f32 %v96_v10, 0.0 }
  0xe2   :  { %v103_v16 = vmax.f32 %v99_v13, 0.0 }
  0xe4   :  { %v104_v17 = vpack.c.bf16 %v103_v16, %v102_v15 }
  0xe6   :  { %295 = vmatmul.mubr.msk.bf16.vlgmr.msra.gmra.mrb[0].mxu1 %vm144_vm2, %v104_v17 }
 0x1b9   :  { %v182_v20 = vpop.f32.mrb[0].mxu1 }
 0x1ba   :  { %v183_v21 = vadd.f32 %v258_v18, %v182_v20  ;;  %v296_v22 = vpop.f32.mrb[1].mxu1 }
 0x1bb   :  { %v185_v24 = vpop.f32.mrb[2].mxu1 }
 0x1bc   :  { %v186_v25 = vadd.f32 %v258_v18, %v185_v24  ;;  %v297_v26 = vpop.f32.mrb[3].mxu1  ;;  %v191_v27 = vadd.f32 %v189_v19, %v183_v21 }
 0x1be   :  { %v193_v28 = vsel %vm57_vm1, %v191_v27, 0.0  ;;  %v192_v29 = vadd.f32 %v190_v23, %v186_v25 }
 0x1bf   :  { %194 = vadd.xlane.f32.xlu0 %v193_v28 }
 0x1c0   :  { %v196_v30 = vsel %vm57_vm1, %v192_v29, 0.0 }
 0x1c3   :  { %197 = vadd.xlane.f32.xlu0 %v196_v30 }
 0x24c   :  { %v195_v31 = vpop.xlane.xlu0 %194 }
 0x24d   :  { %v200_v32 = vmul.f32 0.03125, %v195_v31 }
 0x24f   :  { %v202_v33 = vsub.f32 %v191_v27, %v200_v32 }
 0x250   :  { %v198_v34 = vpop.xlane.xlu0 %197 }
 0x251   :  { %v201_v35 = vmul.f32 0.03125, %v198_v34  ;;  %v204_v36 = vmul.f32 %v202_v33, %v202_v33 }
 0x253   :  { %v203_v37 = vsub.f32 %v192_v29, %v201_v35  ;;  %v206_v38 = vsel %vm57_vm1, %v204_v36, 0.0 }
 0x254   :  { %207 = vadd.xlane.f32.xlu1 %v206_v38 }
 0x255   :  { %v205_v39 = vmul.f32 %v203_v37, %v203_v37 }
 0x257   :  { %v209_v40 = vsel %vm57_vm1, %v205_v39, 0.0 }
 0x258   :  { %210 = vadd.xlane.f32.xlu1 %v209_v40 }
 0x2e1   :  { %v208_v41 = vpop.xlane.xlu1 %207 }
 0x2e2   :  { %v212_v42 = vmul.f32 0.03125, %v208_v41 }
 0x2e4   :  { %v214_v43 = vadd.f32 1e-05, %v212_v42 }
 0x2e5   :  { %v211_v44 = vpop.xlane.xlu1 %210 }
 0x2e6   :  { %308 = vrsqrt.f32 %v214_v43  ;;  %v213_v45 = vmul.f32 0.03125, %v211_v44 }
 0x2e8   :  { %v215_v46 = vadd.f32 1e-05, %v213_v45 }
 0x2ea   :  { %310 = vrsqrt.f32 %v215_v46 }
 0x2f0   :  { %v309_v47 = vpop.eup %308 }
 0x2f1   :  { %v218_v49 = vmul.f32 %v309_v47, %v202_v33 }
 0x2f3   :  { %v227_v51 = vmul.f32 %v264_v48, %v218_v49 }
 0x2f4   :  { %v311_v52 = vpop.eup %310 }
 0x2f5   :  { %v236_v53 = vadd.f32 %v265_v50, %v227_v51  ;;  %v219_v54 = vmul.f32 %v311_v52, %v203_v37 }
 0x2f7   :  { %v268_v55 = vpack.c.bf16 %v236_v53, %v236_v53  ;;  %v228_v56 = vmul.f32 %v264_v48, %v219_v54 }
 0x2f9   :  { %247 = vst.msk [vmem:[%s405_s7] sm:$0xf] %vm246_vm3, %v268_v55  ;;  %v237_v57 = vadd.f32 %v265_v50, %v228_v56 }
 0x2fb   :  { %v269_v58 = vpack.c.bf16 %v237_v57, %v237_v57 }
 0x2fd   :  { %248 = vst.msk [vmem:[%s405_s7 + $0x4] sm:$0xf] %vm246_vm3, %v269_v58 }

// kernel: transformer_forward.53
= control target key start
LH: loop header
LB: loop body
LE: loop exit
PB: predicated region body
PF: predicated region fallthrough
CT: control target
= control target key end

     0   :  { %v178_v1 = vmov 0.0   ;;  %vm179_vm0 = vmmov 0   ;;  %vm20_vm1 = vcmask 490496   ;;  %s233_s0 = inlined_call_operand.vmem [shape: bf16[16,32], index: 0, kind: input, shape index: {}]   ;;  %s234_s1 = inlined_call_operand.vmem [shape: bf16[32,60], index: 1, kind: input, shape index: {}]   ;;  %s235_s2 = inlined_call_operand.vmem [shape: f32[1,60], index: 2, kind: input, shape index: {}]   ;;  %s236_s3 = inlined_call_operand.hbm [shape: f32[16,60], index: 3, kind: output, shape index: {}]  }
   0x1   :  { %v151_v0 = vld [vmem:[%s234_s1] sm:$0xff]   ;;  %138 = vmatprep.subr.bf16.mxu0 %v178_v1  ;;  %v152_v2 = vld [vmem:[%s234_s1 + $0x8] sm:$0xff]   ;;  %142 = vmatprep.mubr.msk.bf16.mxu0 %vm179_vm0, %v178_v1 }
   0x2   :  { %139 = vmatpush3.bf16.msra.mxu0 %v151_v0 }
   0x3   :  { %140 = vmatprep.subr.bf16.mxu0 %v178_v1 }
   0x4   :  { %8 = vsyncpa [#allocation4], 0  ;;  %21 = vst.msk [vmem:[#allocation2] sm:$0xff] %vm20_vm1, %v178_v1  ;;  %v153_v3 = vld [vmem:[%s233_s0] sm:$0xff]   ;;  %vm48_vm2 = vcmask 261120   ;;  %s180_s0 = smov [#allocation3]  }
   0x5   :  { %22 = vst.msk [vmem:[#allocation2 + $0x8] sm:$0xff] %vm20_vm1, %v178_v1  ;;  %v134_v12 = vld [vmem:[%s235_s2] ss:$0 sm:$0xff]  ;;  %s119_s19 = sshll.u32 %s180_s0, 4  ;;  %s120_s19 = int_to_ptr.vmem [resolvable:$true] %s119_s19 }
   0x6   :  { %141 = vmatpush3.bf16.msra.mxu0 %v152_v2  ;;  %s154_s20 = scalar_lea.vmem %s120_s19, 256  ;;  %p159_p1 = scmp.lt.s32.totalorder %s120_s19, %s120_s19 }
   0x7   :  { %p155_p0 = scmp.ne.s32.totalorder %s120_s19, %s154_s20  ;;  %p160_p2 = scmp.lt.s32.totalorder %s154_s20, %s154_s20 }
   0x9   :  { %143 = vmatmul.mubr.msk.bf16.vlgmr.msra.gmra.mrb[0].mxu0 %vm48_vm2, %v153_v3  ;;  %p161_p3 = por %p160_p2, %p159_p1 }
   0xb   :  { %v23_v4 = vld [vmem:[#allocation2] sm:$0xff]  ;;  %p162_p4 = pnand %p161_p3, %p155_p0 }
   0xc   :  { %v24_v6 = vld [vmem:[#allocation2 + $0x8] sm:$0xff] }
  0xdc   :  { %v86_v5 = vpop.f32.mrb[0].mxu0 }
  0xdd   :  { %v93_v7 = vadd.f32 %v86_v5, %v23_v4  ;;  %v144_v8 = vpop.f32.mrb[1].mxu0 }
  0xde   :  { %v89_v9 = vpop.f32.mrb[2].mxu0 }
  0xdf   :  { %96 = vst.msk [vmem:[#allocation2] sm:$0xff] %vm20_vm1, %v93_v7  ;;  %v94_v10 = vadd.f32 %v89_v9, %v24_v6  ;;  %v145_v11 = vpop.f32.mrb[3].mxu0 }
  0xe1   :  { %97 = vst.msk [vmem:[#allocation2 + $0x8] sm:$0xff] %vm20_vm1, %v94_v10 }
  0xe6   :  { %v101_v13 = vld [vmem:[#allocation2] sm:$0xff] }
  0xe7   :  { %v110_v14 = vadd.f32 %v134_v12, %v101_v13 }
  0xe8   :  { %v102_v15 = vld [vmem:[#allocation2 + $0x8] sm:$0xff] }
  0xe9   :  { %v111_v16 = vadd.f32 %v134_v12, %v102_v15  ;;  %112 = vst.msk [vmem:[#allocation3] sm:$0xff] %vm20_vm1, %v110_v14 }
  0xeb   :  { %113 = vst.msk [vmem:[#allocation3 + $0x8] sm:$0xff] %vm20_vm1, %v111_v16 }
  0xec   :  { %165 = shalt.err (!%p162_p4)
}
  0xed   :  { %s166_s22 = scalar_lea.hbm %s236_s3, 256 }
  0xee   :  { %p167_p5 = scmp.ne.s32.totalorder %s236_s3, %s166_s22  ;;  %p170_p6 = scmp.lt.u32.totalorder %s166_s22, %s236_s3 }
  0xf0   :  { %p172_p7 = pnand %p170_p6, %p167_p5 }
  0xf2   :  { %175 = shalt.err (!%p172_p7)
}
  0xf3   :  { %s181_s27 = smov 128   ;;  %s182_s28 = smov 8  }
  0xf4   :  { %125 = dma.vmem_to_hbm [thread:$0]  %s120_s19, 256, %s236_s3, [#allocation4], %s181_s27, %s181_s27, %s182_s28  }
  0xf5   :  { %176 = dma.done.wait [#allocation4], 256  }
  0xf6   :  { %177 = vsyncadd [#allocation4], 4294967040 }
  0xf7   :  { %129 = vsyncpa [#allocation4], 1 }

// kernel: transformer_forward.41
= control target key start
LH: loop header
LB: loop body
LE: loop exit
PB: predicated region body
PF: predicated region fallthrough
CT: control target
= control target key end

     0   :  { %s731_s12 = smov 0   ;;  %s733_s13 = smov 0   ;;  %s806_s0 = inlined_call_operand.vmem [shape: bf16[2,4,8,8], index: 0, kind: input, shape index: {}]   ;;  %s807_s1 = inlined_call_operand.vmem [shape: bf16[2,4,8,8], index: 1, kind: input, shape index: {}]   ;;  %s808_s2 = inlined_call_operand.vmem [shape: bf16[2,4,8,8], index: 2, kind: input, shape index: {}]   ;;  %s809_s3 = inlined_call_operand.vmem [shape: bf16[2,4,8,8], index: 3, kind: output, shape index: {}]  }
   0x1   :  { %s735_s14 = smov 0   ;;  %s737_s15 = smov 0  }
   0x2   :  { %s739_s16 = smov 0  }
   0x3 LB: > { %s28_s17 = sadd.s32 1, %s697_s14  ;;  %s32_s18 = sadd.s32 1, %s701_s15  ;;  %s705_s16 = sphi %s739_s16, %s13_s16   ;;  %s701_s15 = sphi %s737_s15, %s813_s15   ;;  %s697_s14 = sphi %s735_s14, %s812_s14   ;;  %s693_s13 = sphi %s733_s13, %s811_s13   ;;  %s689_s12 = sphi %s731_s12, %s810_s12  }
   0x4   : > { %p30_p0 = scmp.ge.s32.totalorder %s28_s17, 4  ;;  %p586_p1 = scmp.ge.s32.totalorder %s705_s16, 1 }
   0x5   : > { %p203_p2 = scmp.lt.s32.totalorder %s705_s16, 9 }
   0x6   : > { %s815_s17 = smov (%p30_p0, %s28_s17), 0  ;;  %s817_s18 = smov (!%p30_p0, %s32_s18), %s701_s15 }
   0x7   : > { %p204_p3 = pnand %p586_p1, %p203_p2  ;;  %p34_p4 = scmp.ge.s32.totalorder %s817_s18, 2 }
   0x8   : > { %p255_p5 = scmp.lt.s32.totalorder (!%p204_p3), %s693_s13, 1  ;;  %p257_p6 = scmp.lt.s32.totalorder (!%p204_p3), %s689_s12, 3  ;;  %vm301_vm0 = vcmask (!%p204_p3), 64512   ;;  %v707_v0 = vmov (!%p204_p3), 0.0   ;;  %vm708_vm1 = vmmov (!%p204_p3), 0   ;;  %vm309_vm2 = vcmask (!%p204_p3), 1043456  }
   0x9   : > { %s819_s18 = smov (%p34_p4, %s817_s18), 0  ;;  %207 = sbr.rel (%p204_p3) target bundleno = 825 (0x339), region = 32 }
   0xa   : > { %603 = vmatprep.subr.bf16.mxu0 (!%p204_p3), %v707_v0  ;;  %605 = vmatprep.mubr.msk.bf16.mxu0 (!%p204_p3), %vm708_vm1, %v707_v0  ;;  %302 = vst.msk [vmem:[#allocation4] sm:$0xff] (!%p204_p3), %vm301_vm0, %v707_v0  ;;  %vm298_vm3 = vcmask (!%p204_p3), 7168   ;;  %v709_v4 = vmov (!%p204_p3), -inf   ;;  %v710_v11 = vmov (!%p204_p3), 0   ;;  %vm449_vm4 = vcmask (!%p204_p3), 60416  }
   0xb   : > { %609 = vmatprep.subr.bf16.mxu1 (!%p204_p3), %v707_v0  ;;  %611 = vmatprep.mubr.msk.bf16.mxu1 (!%p204_p3), %vm708_vm1, %v707_v0  ;;  %299 = vst.msk [vmem:[#allocation2] sm:$0xff] (!%p204_p3), %vm298_vm3, %v709_v4  ;;  %300 = vst.msk [vmem:[#allocation3] sm:$0xff] (!%p204_p3), %vm298_vm3, %v707_v0 }
   0xc   : > { %659 = vset.pattern.permute.xlu0 (!%p204_p3), %v710_v11  ;;  %660 = vset.pattern.permute.xlu1 (!%p204_p3), %v710_v11 }
  0x10   : > { %s821_s13 = smov (!%p255_p5, %s693_s13), 1  ;;  %s823_s12 = smov (!%p257_p6, %s689_s12), 3 }
  0x11   : > { %s587_s19 = sshll.u32 %s821_s13, 2  ;;  %v378_v32 = vld [vmem:[#allocation4] sm:$0xff] }
  0x12   : > { %s260_s20 = sadd.s32 %s587_s19, %s823_s12  ;;  %v354_v12 = vld [vmem:[#allocation2] sm:$0xff]  ;;  %v370_v26 = vld [vmem:[#allocation3] sm:$0xff] }
  0x13   : > { %s762_s21 = sshll.u32 %s260_s20, 2 }
  0x14   : > { %s273_s24 = scalar_lea.vmem %s807_s1, %s762_s21  ;;  %s262_s27 = scalar_lea.vmem %s806_s0, %s762_s21 }
  0x15   : > { %v304_v1 = vld [vmem:[%s273_s24] sm:$0xf]  ;;  %s284_s30 = scalar_lea.vmem %s808_s2, %s762_s21  ;;  %s292_s6 = scalar_lea.vmem %s809_s3, %s762_s21 }
  0x16   : > { %v311_v2 = vsel %vm309_vm2, %v304_v1, 0  ;;  %v303_v3 = vld [vmem:[%s262_s27] sm:$0xf] }
  0x17   : > { %604 = vmatpush3.bf16.msra.mxu0 %v311_v2  ;;  %v386_v16 = vld [vmem:[%s284_s30] sm:$0xf] }
  0x18   : > { %v391_v17 = vsel %vm309_vm2, %v386_v16, 0 }
  0x19   : > { %610 = vmatpush3.bf16.msra.mxu1 %v391_v17 }
  0x1a   : > { %606 = vmatmul.mubr.msk.bf16.vlgmr.msra.gmra.mrb[0].mxu0 %vm301_vm0, %v303_v3 }
  0xed   : > { %v347_v5 = vpop.f32.mrb[0].mxu0 }
  0xee   : > { %v353_v6 = vmul.f32 0.35355338, %v347_v5  ;;  %v607_v7 = vpop.f32.mrb[1].mxu0 }
  0xef   : > { %v350_v8 = vpop.f32.mrb[2].mxu0 }
  0xf0   : > { %v608_v9 = vpop.f32.mrb[3].mxu0  ;;  %v355_v10 = vsel %vm301_vm0, %v353_v6, -inf }
  0xf1   : > { %356 = vmax.xlane.f32.xlu0 %v355_v10 }
 0x17e   : > { %v357_v13 = vpop.xlane.xlu0 %356 }
 0x17f   : > { %v358_v14 = vmax.f32 %v354_v12, %v357_v13 }
 0x181   : > { %v359_v15 = vsub.f32 %v354_v12, %v358_v14  ;;  %435 = vst.msk [vmem:[#allocation2] sm:$0xff] %vm298_vm3, %v358_v14  ;;  %364 = vperm.xlu0 %659, %v358_v14  }
 0x183   : > { %v360_v24 = vmul.f32 1.442695, %v359_v15 }
 0x200   : > { %v365_v18 = vpop.permute.xlu0 %364 }
 0x201   : > { %v367_v19 = vsub.f32 %v353_v6, %v365_v18 }
 0x203   : > { %v368_v20 = vmul.f32 1.442695, %v367_v19 }
 0x205   : > { %661 = vpow2.f32 %v368_v20 }
 0x206   : > { %663 = vpow2.f32 %v360_v24 }
 0x20f   : > { %v662_v21 = vpop.eup %661 }
 0x210   : > { %v372_v22 = vsel %vm301_vm0, %v662_v21, 0.0  ;;  %v385_v23 = vpack.c.bf16 %v662_v21, %v662_v21  ;;  %v664_v25 = vpop.eup %663 }
 0x211   : > { %373 = vadd.xlane.f32.xlu1 %v372_v22  ;;  %v371_v27 = vmul.f32 %v664_v25, %v370_v26 }
 0x212   : > { %612 = vmatmul.mubr.msk.bf16.vlgmr.msra.gmra.mrb[0].mxu1 %vm301_vm0, %v385_v23 }
 0x222   : > { %381 = vperm.xlu1 %660, %v664_v25  }
 0x29e   : > { %v374_v28 = vpop.xlane.xlu1 %373 }
 0x29f   : > { %v375_v29 = vadd.f32 %v374_v28, %v371_v27 }
 0x2a1   : > { %377 = vst.msk [vmem:[#allocation3] sm:$0xff] %vm298_vm3, %v375_v29 }
 0x2a2   : > { %v382_v33 = vpop.permute.xlu1 %381 }
 0x2a3   : > { %v384_v34 = vmul.f32 %v382_v33, %v378_v32 }
 0x2a8   : > { %v440_v30 = vld [vmem:[#allocation3] sm:$0xff] }
 0x2a9   : > { %665 = vrcp.f32 %v440_v30 }
 0x2b3   : > { %v666_v31 = vpop.eup %665 }
 0x2b4   : > { %444 = vperm.xlu1 %660, %v666_v31  }
 0x2e5   : > { %v427_v35 = vpop.f32.mrb[0].mxu1 }
 0x2e6   : > { %v433_v36 = vadd.f32 %v427_v35, %v384_v34  ;;  %v613_v37 = vpop.f32.mrb[1].mxu1 }
 0x2e7   : > { %v430_v38 = vpop.f32.mrb[2].mxu1 }
 0x2e8   : > { %434 = vst.msk [vmem:[#allocation4] sm:$0xff] %vm301_vm0, %v433_v36  ;;  %v614_v39 = vpop.f32.mrb[3].mxu1 }
 0x2ef   : > { %v439_v40 = vld [vmem:[#allocation4] sm:$0xff] }
 0x333   : > { %v445_v41 = vpop.permute.xlu1 %444 }
 0x334   : > { %v447_v42 = vmul.f32 %v445_v41, %v439_v40 }
 0x336   : > { %v448_v43 = vpack.c.bf16 %v447_v42, %v447_v42 }
 0x338   : > { %450 = vst.msk [vmem:[%s292_s6] sm:$0xf] %vm449_vm4, %v448_v43 }
 0x339 PF: > { %s13_s16 = sadd.s32 1, %s705_s16   ;;  %s810_s12 = smov %s697_s14 }
 0x33a   : > { %p10_p7 = scmp.ge.s32.totalorder %s13_s16, 10   ;;  %s811_s13 = smov %s701_s15 }
 0x33b   : > { %s812_s14 = smov %s815_s17  ;;  %s813_s15 = smov %s819_s18 }
 0x33c   :  { %12 = sbr.rel (!%p10_p7) target bundleno = 3 (0x3), region = 76 }

</bundles_post_ra>
